<compile_context>
chip_gen: v7x
topology: tpu7x:2x2x1
jax: 0.10.0
libtpu: 0.0.40
codegen_flags: <defaults>
</compile_context>

<pallas_src>
import functools

import jax
import jax.numpy as jnp
from jax.experimental import pallas as pl

# ----- hyperparameters (the "P" namespace of the original script) -----------
INPUT_SIZE = 16     # P.INPUT_SIZE
HIDDEN_SIZE = 32    # P.HIDDEN_SIZE
NUM_LAYERS = 2      # P.NUM_LAYERS (the fused kernel is specialized to 2 layers)
BATCH_FIRST = True  # P.BATCH_FIRST
L = 8               # P.L  (sequence length)
N_CLASSES = 10      # P.N_CLASSES
BATCH = 2
LANE = 128          # lane-dense padding for the tiny (B, 10) logits store


# ------------------------------ fused kernel --------------------------------
def _fused_kernel(x_ref, wih1_ref, b1_ref, wblk_ref, b2_ref, wlin_ref, blin_ref,
                  out_ref, *, batch, hidden, seq_len):
    B, H, T = batch, hidden, seq_len

    # Hoisted layer-1 input projection for ALL timesteps (one MXU call).
    # x arrives time-major (T*B, D), so the per-step read gx1[t] is a free
    # leading-axis index (no per-step sublane select on the critical path).
    gx1 = (jnp.dot(x_ref[...], wih1_ref[...], preferred_element_type=jnp.float32)
           + b1_ref[...]).reshape(T, B, 4 * H)

    wblk = wblk_ref[...]          # (2H, 8H) bf16 fused block weight (~8 vregs)
    b2 = b2_ref[...]              # (1, 4H)

    h1 = jnp.zeros((B, H), jnp.float32)
    c1 = jnp.zeros((B, H), jnp.float32)
    h2 = jnp.zeros((B, H), jnp.float32)
    c2 = jnp.zeros((B, H), jnp.float32)
    rec1 = jnp.zeros((B, 4 * H), jnp.float32)       # h1_{-1} @ Whh1^T == 0
    out_acc = jnp.zeros(out_ref.shape, jnp.float32)

    for t in range(T):            # fully unrolled; every index is static
        # ---------------- layer 1, step t ----------------
        g1 = gx1[t] + rec1
        s1 = jax.nn.sigmoid(g1)                     # whole-vreg EUP op on (B, 4H)
        t1 = jnp.tanh(g1)                           # whole-vreg EUP op on (B, 4H)
        c1 = s1[:, H:2 * H] * c1 + s1[:, 0:H] * t1[:, 2 * H:3 * H]
        h1 = s1[:, 3 * H:4 * H] * jnp.tanh(c1)

        # ---- ONE fused recurrent matmul for both layers (bf16 single pass):
        #      [h1_t, h2_{t-1}] @ [[Whh1^T, Wih2^T], [0, Whh2^T]]
        lhs = jnp.concatenate([h1, h2], axis=1).astype(jnp.bfloat16)   # (B, 2H)
        z = jnp.dot(lhs, wblk, preferred_element_type=jnp.float32)     # (B, 8H)
        rec1 = z[:, 0:4 * H]                        # layer-1 recurrent term for t+1
        g2 = z[:, 4 * H:8 * H] + b2                 # layer-2 gate pre-activation @ t

        # ---------------- layer 2, step t ----------------
        s2 = jax.nn.sigmoid(g2)
        t2 = jnp.tanh(g2)
        c2 = s2[:, H:2 * H] * c2 + s2[:, 0:H] * t2[:, 2 * H:3 * H]
        h2 = s2[:, 3 * H:4 * H] * jnp.tanh(c2)

        # ---- incremental Linear (PyTorch batch_first flatten): independent of
        #      the recurrence, so this matmul hides under it; replaces masked
        #      32-lane scratch stores + an epilogue matmul.  Slice is tile-aligned.
        out_acc = out_acc + jnp.dot(h2, wlin_ref[t * H:(t + 1) * H, :],
                                    preferred_element_type=jnp.float32)

    # 128-lane padded, unmasked store; wrapper slices back to N_CLASSES.
    out_ref[...] = (out_acc + blin_ref[...]).astype(out_ref.dtype)


# ------------------------------ host wrapper ---------------------------------
def _full_spec(shape):
    zeros = (0,) * len(shape)
    return pl.BlockSpec(tuple(shape), lambda: zeros)


@jax.jit
def model_mnist_forward(prepped, x):
    """x: (B, L, INPUT_SIZE) batch_first. Returns (B, N_CLASSES)."""
    B, T, D = x.shape
    H = HIDDEN_SIZE

    # One-time layout plumbing: time-major, flattened rows r = t*B + b.
    x_tm = jnp.transpose(x, (1, 0, 2)).reshape(T * B, D)

    args = [x_tm, prepped["wih1_t"], prepped["bias1"], prepped["wblk"],
            prepped["bias2"], prepped["wlin"], prepped["blin"]]

    out = pl.pallas_call(
        functools.partial(_fused_kernel, batch=B, hidden=H, seq_len=T),
        in_specs=[_full_spec(a.shape) for a in args],
        out_specs=_full_spec((B, LANE)),
        out_shape=jax.ShapeDtypeStruct((B, LANE), jnp.float32),
    )(*args)
    return out[:, :N_CLASSES]


# ------------------------------ parameters -----------------------------------
def init_params(key):
    """PyTorch-style uniform(-1/sqrt(H), 1/sqrt(H)) init, PyTorch layouts."""
    params = {"lstm": []}
    bound = 1.0 / jnp.sqrt(jnp.float32(HIDDEN_SIZE))
    for layer in range(NUM_LAYERS):
        d_in = INPUT_SIZE if layer == 0 else HIDDEN_SIZE
        key, k1, k2, k3, k4 = jax.random.split(key, 5)
        params["lstm"].append({
            "w_ih": jax.random.uniform(k1, (4 * HIDDEN_SIZE, d_in), jnp.float32, -bound, bound),
            "w_hh": jax.random.uniform(k2, (4 * HIDDEN_SIZE, HIDDEN_SIZE), jnp.float32, -bound, bound),
            "b_ih": jax.random.uniform(k3, (4 * HIDDEN_SIZE,), jnp.float32, -bound, bound),
            "b_hh": jax.random.uniform(k4, (4 * HIDDEN_SIZE,), jnp.float32, -bound, bound),
        })
    feat = L * HIDDEN_SIZE
    lbound = 1.0 / jnp.sqrt(jnp.float32(feat))
    key, k1, k2 = jax.random.split(key, 3)
    params["linear_w"] = jax.random.uniform(k1, (N_CLASSES, feat), jnp.float32, -lbound, lbound)
    params["linear_b"] = jax.random.uniform(k2, (N_CLASSES,), jnp.float32, -lbound, lbound)
    return params


def prepare_params(params):
    """One-time layout prep: transposed weights, fused biases, fused 2-layer
    block recurrent weight (bf16), lane-padded Linear."""
    assert len(params["lstm"]) == 2, "fused kernel is specialized to NUM_LAYERS=2"
    H = HIDDEN_SIZE
    l0, l1 = params["lstm"]

    prepped = {
        "wih1_t": jnp.transpose(l0["w_ih"]),                              # (D_in, 4H)
        "bias1": (l0["b_ih"] + l0["b_hh"]).reshape(1, 4 * H),             # (1, 4H)
        "bias2": (l1["b_ih"] + l1["b_hh"]).reshape(1, 4 * H),             # (1, 4H)
    }

    # Fused block recurrent weight: [h1_t, h2_{t-1}] @ wblk gives
    #   cols [0,4H)  : h1_t @ Whh1^T                 (layer-1 recurrence for t+1)
    #   cols [4H,8H) : h1_t @ Wih2^T + h2_{t-1}@Whh2^T (layer-2 gates for t)
    wblk = jnp.zeros((2 * H, 8 * H), jnp.float32)
    wblk = wblk.at[:H, :4 * H].set(jnp.transpose(l0["w_hh"]))
    wblk = wblk.at[:H, 4 * H:].set(jnp.transpose(l1["w_ih"]))
    wblk = wblk.at[H:, 4 * H:].set(jnp.transpose(l1["w_hh"]))
    prepped["wblk"] = wblk.astype(jnp.bfloat16)    # single MXU pass per step

    w_t = jnp.transpose(params["linear_w"])                               # (L*H, N)
    feat = w_t.shape[0]
    prepped["wlin"] = jnp.zeros((feat, LANE), jnp.float32).at[:, :N_CLASSES].set(w_t)
    prepped["blin"] = jnp.zeros((1, LANE), jnp.float32).at[0, :N_CLASSES].set(params["linear_b"])
    return prepped


# ------------------------------ pure-JAX reference ---------------------------
def reference_forward(params, x):
    B = x.shape[0]
    h_tm = jnp.transpose(x, (1, 0, 2))            # (T, B, D)
    for lp in params["lstm"]:
        T = h_tm.shape[0]
        H = lp["w_hh"].shape[1]
        wih_t, whh_t = lp["w_ih"].T, lp["w_hh"].T
        bias = lp["b_ih"] + lp["b_hh"]
        h = jnp.zeros((B, H), jnp.float32)
        c = jnp.zeros((B, H), jnp.float32)
        outs = []
        for t in range(T):
            g = h_tm[t] @ wih_t + h @ whh_t + bias
            i = jax.nn.sigmoid(g[:, :H])
            f = jax.nn.sigmoid(g[:, H:2 * H])
            gg = jnp.tanh(g[:, 2 * H:3 * H])
            o = jax.nn.sigmoid(g[:, 3 * H:])
            c = f * c + i * gg
            h = o * jnp.tanh(c)
            outs.append(h)
        h_tm = jnp.stack(outs, axis=0)
    flat = jnp.transpose(h_tm, (1, 0, 2)).reshape(B, -1)
    return flat @ params["linear_w"].T + params["linear_b"]


if __name__ == "__main__":
    key = jax.random.PRNGKey(0)
    pkey, xkey = jax.random.split(key)
    params = init_params(pkey)
    prepped = prepare_params(params)
    x = jax.random.normal(xkey, (BATCH, L, INPUT_SIZE), dtype=jnp.float32)

    out = model_mnist_forward(prepped, x)
    jax.block_until_ready(out)
    assert out.shape == (BATCH, N_CLASSES), out.shape

    ref = reference_forward(params, x)
    assert jnp.allclose(out, ref, rtol=2e-2, atol=2e-2), float(jnp.max(jnp.abs(out - ref)))
    print("KERNEL_OK")
</pallas_src>

<mosaic_0001>
module attributes {stable_mosaic.version = 11 : i64} {
  func.func @_fused_kernel(%arg0: memref<16x16xf32, #tpu.memory_space<vmem>>, %arg1: memref<16x128xf32, #tpu.memory_space<vmem>>, %arg2: memref<1x128xf32, #tpu.memory_space<vmem>>, %arg3: memref<64x256xbf16, #tpu.memory_space<vmem>>, %arg4: memref<1x128xf32, #tpu.memory_space<vmem>>, %arg5: memref<256x128xf32, #tpu.memory_space<vmem>>, %arg6: memref<1x128xf32, #tpu.memory_space<vmem>>, %arg7: memref<2x128xf32, #tpu.memory_space<vmem>>) attributes {dimension_semantics = [], scalar_prefetch = 0 : i64, scratch_operands = 0 : i64, tpu.core_type = #tpu.core_type<tc>} {
    %c0 = arith.constant 0 : index
    %c0_0 = arith.constant 0 : index
    %0 = vector.load %arg0[%c0, %c0_0] : memref<16x16xf32, #tpu.memory_space<vmem>>, vector<16x16xf32>
    %c0_1 = arith.constant 0 : index
    %c0_2 = arith.constant 0 : index
    %1 = vector.load %arg1[%c0_1, %c0_2] : memref<16x128xf32, #tpu.memory_space<vmem>>, vector<16x128xf32>
    %cst = arith.constant dense<0.000000e+00> : vector<16x128xf32>
    %2 = tpu.matmul %0, %1, %cst {dimension_numbers = #tpu.dot_dimension_numbers<[1], [0], [0], [1], [0, 0, 1, 1], [], []>} : vector<16x16xf32>, vector<16x128xf32>, vector<16x128xf32> -> vector<16x128xf32>
    %c0_3 = arith.constant 0 : index
    %c0_4 = arith.constant 0 : index
    %3 = vector.load %arg2[%c0_3, %c0_4] : memref<1x128xf32, #tpu.memory_space<vmem>>, vector<1x128xf32>
    %4 = vector.broadcast %3 : vector<1x128xf32> to vector<16x128xf32>
    %5 = arith.addf %2, %4 : vector<16x128xf32>
    %6 = vector.shape_cast %5 : vector<16x128xf32> to vector<8x2x128xf32>
    %c0_5 = arith.constant 0 : index
    %c0_6 = arith.constant 0 : index
    %7 = vector.load %arg3[%c0_5, %c0_6] : memref<64x256xbf16, #tpu.memory_space<vmem>>, vector<64x256xbf16>
    %c0_7 = arith.constant 0 : index
    %c0_8 = arith.constant 0 : index
    %8 = vector.load %arg4[%c0_7, %c0_8] : memref<1x128xf32, #tpu.memory_space<vmem>>, vector<1x128xf32>
    %cst_9 = arith.constant 0.000000e+00 : f32
    %9 = vector.broadcast %cst_9 : f32 to vector<2x32xf32>
    %cst_10 = arith.constant 0.000000e+00 : f32
    %10 = vector.broadcast %cst_10 : f32 to vector<2x32xf32>
    %cst_11 = arith.constant 0.000000e+00 : f32
    %11 = vector.broadcast %cst_11 : f32 to vector<2x32xf32>
    %cst_12 = arith.constant 0.000000e+00 : f32
    %12 = vector.broadcast %cst_12 : f32 to vector<2x128xf32>
    %cst_13 = arith.constant 0.000000e+00 : f32
    %13 = vector.broadcast %cst_13 : f32 to vector<2x128xf32>
    %14 = vector.extract_strided_slice %6 {offsets = [0, 0, 0], sizes = [1, 2, 128], strides = [1, 1, 1]} : vector<8x2x128xf32> to vector<1x2x128xf32>
    %15 = vector.shape_cast %14 : vector<1x2x128xf32> to vector<2x128xf32>
    %16 = arith.addf %15, %12 : vector<2x128xf32>
    %17 = arith.negf %16 : vector<2x128xf32>
    %18 = math.exp %17 : vector<2x128xf32>
    %cst_14 = arith.constant 1.000000e+00 : f32
    %19 = vector.broadcast %cst_14 : f32 to vector<2x128xf32>
    %20 = arith.addf %19, %18 : vector<2x128xf32>
    %21 = arith.divf %19, %20 : vector<2x128xf32>
    %22 = math.tanh %16 : vector<2x128xf32>
    %23 = vector.extract_strided_slice %21 {offsets = [0, 32], sizes = [2, 32], strides = [1, 1]} : vector<2x128xf32> to vector<2x32xf32>
    %24 = arith.mulf %23, %9 : vector<2x32xf32>
    %25 = vector.extract_strided_slice %21 {offsets = [0, 0], sizes = [2, 32], strides = [1, 1]} : vector<2x128xf32> to vector<2x32xf32>
    %26 = vector.extract_strided_slice %22 {offsets = [0, 64], sizes = [2, 32], strides = [1, 1]} : vector<2x128xf32> to vector<2x32xf32>
    %27 = arith.mulf %25, %26 : vector<2x32xf32>
    %28 = arith.addf %24, %27 : vector<2x32xf32>
    %29 = vector.extract_strided_slice %21 {offsets = [0, 96], sizes = [2, 32], strides = [1, 1]} : vector<2x128xf32> to vector<2x32xf32>
    %30 = math.tanh %28 : vector<2x32xf32>
    %31 = arith.mulf %29, %30 : vector<2x32xf32>
    %32 = tpu.concatenate %31, %10 in 1 : vector<2x32xf32>, vector<2x32xf32> -> vector<2x64xf32>
    %33 = arith.truncf %32 : vector<2x64xf32> to vector<2x64xbf16>
    %cst_15 = arith.constant dense<0.000000e+00> : vector<2x256xf32>
    %34 = tpu.matmul %33, %7, %cst_15 {dimension_numbers = #tpu.dot_dimension_numbers<[1], [0], [0], [1], [0, 0, 1, 1], [], []>} : vector<2x64xbf16>, vector<64x256xbf16>, vector<2x256xf32> -> vector<2x256xf32>
    %35 = vector.extract_strided_slice %34 {offsets = [0, 0], sizes = [2, 128], strides = [1, 1]} : vector<2x256xf32> to vector<2x128xf32>
    %36 = vector.extract_strided_slice %34 {offsets = [0, 128], sizes = [2, 128], strides = [1, 1]} : vector<2x256xf32> to vector<2x128xf32>
    %37 = vector.broadcast %8 : vector<1x128xf32> to vector<2x128xf32>
    %38 = arith.addf %36, %37 : vector<2x128xf32>
    %39 = arith.negf %38 : vector<2x128xf32>
    %40 = math.exp %39 : vector<2x128xf32>
    %cst_16 = arith.constant 1.000000e+00 : f32
    %41 = vector.broadcast %cst_16 : f32 to vector<2x128xf32>
    %42 = arith.addf %41, %40 : vector<2x128xf32>
    %43 = arith.divf %41, %42 : vector<2x128xf32>
    %44 = math.tanh %38 : vector<2x128xf32>
    %45 = vector.extract_strided_slice %43 {offsets = [0, 32], sizes = [2, 32], strides = [1, 1]} : vector<2x128xf32> to vector<2x32xf32>
    %46 = arith.mulf %45, %11 : vector<2x32xf32>
    %47 = vector.extract_strided_slice %43 {offsets = [0, 0], sizes = [2, 32], strides = [1, 1]} : vector<2x128xf32> to vector<2x32xf32>
    %48 = vector.extract_strided_slice %44 {offsets = [0, 64], sizes = [2, 32], strides = [1, 1]} : vector<2x128xf32> to vector<2x32xf32>
    %49 = arith.mulf %47, %48 : vector<2x32xf32>
    %50 = arith.addf %46, %49 : vector<2x32xf32>
    %51 = vector.extract_strided_slice %43 {offsets = [0, 96], sizes = [2, 32], strides = [1, 1]} : vector<2x128xf32> to vector<2x32xf32>
    %52 = math.tanh %50 : vector<2x32xf32>
    %53 = arith.mulf %51, %52 : vector<2x32xf32>
    %c0_17 = arith.constant 0 : index
    %c0_18 = arith.constant 0 : index
    %54 = vector.load %arg5[%c0_17, %c0_18] : memref<256x128xf32, #tpu.memory_space<vmem>>, vector<32x128xf32>
    %cst_19 = arith.constant dense<0.000000e+00> : vector<2x128xf32>
    %55 = tpu.matmul %53, %54, %cst_19 {dimension_numbers = #tpu.dot_dimension_numbers<[1], [0], [0], [1], [0, 0, 1, 1], [], []>} : vector<2x32xf32>, vector<32x128xf32>, vector<2x128xf32> -> vector<2x128xf32>
    %56 = arith.addf %13, %55 : vector<2x128xf32>
    %57 = vector.extract_strided_slice %6 {offsets = [1, 0, 0], sizes = [1, 2, 128], strides = [1, 1, 1]} : vector<8x2x128xf32> to vector<1x2x128xf32>
    %58 = vector.shape_cast %57 : vector<1x2x128xf32> to vector<2x128xf32>
    %59 = arith.addf %58, %35 : vector<2x128xf32>
    %60 = arith.negf %59 : vector<2x128xf32>
    %61 = math.exp %60 : vector<2x128xf32>
    %cst_20 = arith.constant 1.000000e+00 : f32
    %62 = vector.broadcast %cst_20 : f32 to vector<2x128xf32>
    %63 = arith.addf %62, %61 : vector<2x128xf32>
    %64 = arith.divf %62, %63 : vector<2x128xf32>
    %65 = math.tanh %59 : vector<2x128xf32>
    %66 = vector.extract_strided_slice %64 {offsets = [0, 32], sizes = [2, 32], strides = [1, 1]} : vector<2x128xf32> to vector<2x32xf32>
    %67 = arith.mulf %66, %28 : vector<2x32xf32>
    %68 = vector.extract_strided_slice %64 {offsets = [0, 0], sizes = [2, 32], strides = [1, 1]} : vector<2x128xf32> to vector<2x32xf32>
    %69 = vector.extract_strided_slice %65 {offsets = [0, 64], sizes = [2, 32], strides = [1, 1]} : vector<2x128xf32> to vector<2x32xf32>
    %70 = arith.mulf %68, %69 : vector<2x32xf32>
    %71 = arith.addf %67, %70 : vector<2x32xf32>
    %72 = vector.extract_strided_slice %64 {offsets = [0, 96], sizes = [2, 32], strides = [1, 1]} : vector<2x128xf32> to vector<2x32xf32>
    %73 = math.tanh %71 : vector<2x32xf32>
    %74 = arith.mulf %72, %73 : vector<2x32xf32>
    %75 = tpu.concatenate %74, %53 in 1 : vector<2x32xf32>, vector<2x32xf32> -> vector<2x64xf32>
    %76 = arith.truncf %75 : vector<2x64xf32> to vector<2x64xbf16>
    %cst_21 = arith.constant dense<0.000000e+00> : vector<2x256xf32>
    %77 = tpu.matmul %76, %7, %cst_21 {dimension_numbers = #tpu.dot_dimension_numbers<[1], [0], [0], [1], [0, 0, 1, 1], [], []>} : vector<2x64xbf16>, vector<64x256xbf16>, vector<2x256xf32> -> vector<2x256xf32>
    %78 = vector.extract_strided_slice %77 {offsets = [0, 0], sizes = [2, 128], strides = [1, 1]} : vector<2x256xf32> to vector<2x128xf32>
    %79 = vector.extract_strided_slice %77 {offsets = [0, 128], sizes = [2, 128], strides = [1, 1]} : vector<2x256xf32> to vector<2x128xf32>
    %80 = vector.broadcast %8 : vector<1x128xf32> to vector<2x128xf32>
    %81 = arith.addf %79, %80 : vector<2x128xf32>
    %82 = arith.negf %81 : vector<2x128xf32>
    %83 = math.exp %82 : vector<2x128xf32>
    %cst_22 = arith.constant 1.000000e+00 : f32
    %84 = vector.broadcast %cst_22 : f32 to vector<2x128xf32>
    %85 = arith.addf %84, %83 : vector<2x128xf32>
    %86 = arith.divf %84, %85 : vector<2x128xf32>
    %87 = math.tanh %81 : vector<2x128xf32>
    %88 = vector.extract_strided_slice %86 {offsets = [0, 32], sizes = [2, 32], strides = [1, 1]} : vector<2x128xf32> to vector<2x32xf32>
    %89 = arith.mulf %88, %50 : vector<2x32xf32>
    %90 = vector.extract_strided_slice %86 {offsets = [0, 0], sizes = [2, 32], strides = [1, 1]} : vector<2x128xf32> to vector<2x32xf32>
    %91 = vector.extract_strided_slice %87 {offsets = [0, 64], sizes = [2, 32], strides = [1, 1]} : vector<2x128xf32> to vector<2x32xf32>
    %92 = arith.mulf %90, %91 : vector<2x32xf32>
    %93 = arith.addf %89, %92 : vector<2x32xf32>
    %94 = vector.extract_strided_slice %86 {offsets = [0, 96], sizes = [2, 32], strides = [1, 1]} : vector<2x128xf32> to vector<2x32xf32>
    %95 = math.tanh %93 : vector<2x32xf32>
    %96 = arith.mulf %94, %95 : vector<2x32xf32>
    %c32 = arith.constant 32 : index
    %c0_23 = arith.constant 0 : index
    %97 = vector.load %arg5[%c32, %c0_23] : memref<256x128xf32, #tpu.memory_space<vmem>>, vector<32x128xf32>
    %cst_24 = arith.constant dense<0.000000e+00> : vector<2x128xf32>
    %98 = tpu.matmul %96, %97, %cst_24 {dimension_numbers = #tpu.dot_dimension_numbers<[1], [0], [0], [1], [0, 0, 1, 1], [], []>} : vector<2x32xf32>, vector<32x128xf32>, vector<2x128xf32> -> vector<2x128xf32>
    %99 = arith.addf %56, %98 : vector<2x128xf32>
    %100 = vector.extract_strided_slice %6 {offsets = [2, 0, 0], sizes = [1, 2, 128], strides = [1, 1, 1]} : vector<8x2x128xf32> to vector<1x2x128xf32>
    %101 = vector.shape_cast %100 : vector<1x2x128xf32> to vector<2x128xf32>
    %102 = arith.addf %101, %78 : vector<2x128xf32>
    %103 = arith.negf %102 : vector<2x128xf32>
    %104 = math.exp %103 : vector<2x128xf32>
    %cst_25 = arith.constant 1.000000e+00 : f32
    %105 = vector.broadcast %cst_25 : f32 to vector<2x128xf32>
    %106 = arith.addf %105, %104 : vector<2x128xf32>
    %107 = arith.divf %105, %106 : vector<2x128xf32>
    %108 = math.tanh %102 : vector<2x128xf32>
    %109 = vector.extract_strided_slice %107 {offsets = [0, 32], sizes = [2, 32], strides = [1, 1]} : vector<2x128xf32> to vector<2x32xf32>
    %110 = arith.mulf %109, %71 : vector<2x32xf32>
    %111 = vector.extract_strided_slice %107 {offsets = [0, 0], sizes = [2, 32], strides = [1, 1]} : vector<2x128xf32> to vector<2x32xf32>
    %112 = vector.extract_strided_slice %108 {offsets = [0, 64], sizes = [2, 32], strides = [1, 1]} : vector<2x128xf32> to vector<2x32xf32>
    %113 = arith.mulf %111, %112 : vector<2x32xf32>
    %114 = arith.addf %110, %113 : vector<2x32xf32>
    %115 = vector.extract_strided_slice %107 {offsets = [0, 96], sizes = [2, 32], strides = [1, 1]} : vector<2x128xf32> to vector<2x32xf32>
    %116 = math.tanh %114 : vector<2x32xf32>
    %117 = arith.mulf %115, %116 : vector<2x32xf32>
    %118 = tpu.concatenate %117, %96 in 1 : vector<2x32xf32>, vector<2x32xf32> -> vector<2x64xf32>
    %119 = arith.truncf %118 : vector<2x64xf32> to vector<2x64xbf16>
    %cst_26 = arith.constant dense<0.000000e+00> : vector<2x256xf32>
    %120 = tpu.matmul %119, %7, %cst_26 {dimension_numbers = #tpu.dot_dimension_numbers<[1], [0], [0], [1], [0, 0, 1, 1], [], []>} : vector<2x64xbf16>, vector<64x256xbf16>, vector<2x256xf32> -> vector<2x256xf32>
    %121 = vector.extract_strided_slice %120 {offsets = [0, 0], sizes = [2, 128], strides = [1, 1]} : vector<2x256xf32> to vector<2x128xf32>
    %122 = vector.extract_strided_slice %120 {offsets = [0, 128], sizes = [2, 128], strides = [1, 1]} : vector<2x256xf32> to vector<2x128xf32>
    %123 = vector.broadcast %8 : vector<1x128xf32> to vector<2x128xf32>
    %124 = arith.addf %122, %123 : vector<2x128xf32>
    %125 = arith.negf %124 : vector<2x128xf32>
    %126 = math.exp %125 : vector<2x128xf32>
    %cst_27 = arith.constant 1.000000e+00 : f32
    %127 = vector.broadcast %cst_27 : f32 to vector<2x128xf32>
    %128 = arith.addf %127, %126 : vector<2x128xf32>
    %129 = arith.divf %127, %128 : vector<2x128xf32>
    %130 = math.tanh %124 : vector<2x128xf32>
    %131 = vector.extract_strided_slice %129 {offsets = [0, 32], sizes = [2, 32], strides = [1, 1]} : vector<2x128xf32> to vector<2x32xf32>
    %132 = arith.mulf %131, %93 : vector<2x32xf32>
    %133 = vector.extract_strided_slice %129 {offsets = [0, 0], sizes = [2, 32], strides = [1, 1]} : vector<2x128xf32> to vector<2x32xf32>
    %134 = vector.extract_strided_slice %130 {offsets = [0, 64], sizes = [2, 32], strides = [1, 1]} : vector<2x128xf32> to vector<2x32xf32>
    %135 = arith.mulf %133, %134 : vector<2x32xf32>
    %136 = arith.addf %132, %135 : vector<2x32xf32>
    %137 = vector.extract_strided_slice %129 {offsets = [0, 96], sizes = [2, 32], strides = [1, 1]} : vector<2x128xf32> to vector<2x32xf32>
    %138 = math.tanh %136 : vector<2x32xf32>
    %139 = arith.mulf %137, %138 : vector<2x32xf32>
    %c64 = arith.constant 64 : index
    %c0_28 = arith.constant 0 : index
    %140 = vector.load %arg5[%c64, %c0_28] : memref<256x128xf32, #tpu.memory_space<vmem>>, vector<32x128xf32>
    %cst_29 = arith.constant dense<0.000000e+00> : vector<2x128xf32>
    %141 = tpu.matmul %139, %140, %cst_29 {dimension_numbers = #tpu.dot_dimension_numbers<[1], [0], [0], [1], [0, 0, 1, 1], [], []>} : vector<2x32xf32>, vector<32x128xf32>, vector<2x128xf32> -> vector<2x128xf32>
    %142 = arith.addf %99, %141 : vector<2x128xf32>
    %143 = vector.extract_strided_slice %6 {offsets = [3, 0, 0], sizes = [1, 2, 128], strides = [1, 1, 1]} : vector<8x2x128xf32> to vector<1x2x128xf32>
    %144 = vector.shape_cast %143 : vector<1x2x128xf32> to vector<2x128xf32>
    %145 = arith.addf %144, %121 : vector<2x128xf32>
    %146 = arith.negf %145 : vector<2x128xf32>
    %147 = math.exp %146 : vector<2x128xf32>
    %cst_30 = arith.constant 1.000000e+00 : f32
    %148 = vector.broadcast %cst_30 : f32 to vector<2x128xf32>
    %149 = arith.addf %148, %147 : vector<2x128xf32>
    %150 = arith.divf %148, %149 : vector<2x128xf32>
    %151 = math.tanh %145 : vector<2x128xf32>
    %152 = vector.extract_strided_slice %150 {offsets = [0, 32], sizes = [2, 32], strides = [1, 1]} : vector<2x128xf32> to vector<2x32xf32>
    %153 = arith.mulf %152, %114 : vector<2x32xf32>
    %154 = vector.extract_strided_slice %150 {offsets = [0, 0], sizes = [2, 32], strides = [1, 1]} : vector<2x128xf32> to vector<2x32xf32>
    %155 = vector.extract_strided_slice %151 {offsets = [0, 64], sizes = [2, 32], strides = [1, 1]} : vector<2x128xf32> to vector<2x32xf32>
    %156 = arith.mulf %154, %155 : vector<2x32xf32>
    %157 = arith.addf %153, %156 : vector<2x32xf32>
    %158 = vector.extract_strided_slice %150 {offsets = [0, 96], sizes = [2, 32], strides = [1, 1]} : vector<2x128xf32> to vector<2x32xf32>
    %159 = math.tanh %157 : vector<2x32xf32>
    %160 = arith.mulf %158, %159 : vector<2x32xf32>
    %161 = tpu.concatenate %160, %139 in 1 : vector<2x32xf32>, vector<2x32xf32> -> vector<2x64xf32>
    %162 = arith.truncf %161 : vector<2x64xf32> to vector<2x64xbf16>
    %cst_31 = arith.constant dense<0.000000e+00> : vector<2x256xf32>
    %163 = tpu.matmul %162, %7, %cst_31 {dimension_numbers = #tpu.dot_dimension_numbers<[1], [0], [0], [1], [0, 0, 1, 1], [], []>} : vector<2x64xbf16>, vector<64x256xbf16>, vector<2x256xf32> -> vector<2x256xf32>
    %164 = vector.extract_strided_slice %163 {offsets = [0, 0], sizes = [2, 128], strides = [1, 1]} : vector<2x256xf32> to vector<2x128xf32>
    %165 = vector.extract_strided_slice %163 {offsets = [0, 128], sizes = [2, 128], strides = [1, 1]} : vector<2x256xf32> to vector<2x128xf32>
    %166 = vector.broadcast %8 : vector<1x128xf32> to vector<2x128xf32>
    %167 = arith.addf %165, %166 : vector<2x128xf32>
    %168 = arith.negf %167 : vector<2x128xf32>
    %169 = math.exp %168 : vector<2x128xf32>
    %cst_32 = arith.constant 1.000000e+00 : f32
    %170 = vector.broadcast %cst_32 : f32 to vector<2x128xf32>
    %171 = arith.addf %170, %169 : vector<2x128xf32>
    %172 = arith.divf %170, %171 : vector<2x128xf32>
    %173 = math.tanh %167 : vector<2x128xf32>
    %174 = vector.extract_strided_slice %172 {offsets = [0, 32], sizes = [2, 32], strides = [1, 1]} : vector<2x128xf32> to vector<2x32xf32>
    %175 = arith.mulf %174, %136 : vector<2x32xf32>
    %176 = vector.extract_strided_slice %172 {offsets = [0, 0], sizes = [2, 32], strides = [1, 1]} : vector<2x128xf32> to vector<2x32xf32>
    %177 = vector.extract_strided_slice %173 {offsets = [0, 64], sizes = [2, 32], strides = [1, 1]} : vector<2x128xf32> to vector<2x32xf32>
    %178 = arith.mulf %176, %177 : vector<2x32xf32>
    %179 = arith.addf %175, %178 : vector<2x32xf32>
    %180 = vector.extract_strided_slice %172 {offsets = [0, 96], sizes = [2, 32], strides = [1, 1]} : vector<2x128xf32> to vector<2x32xf32>
    %181 = math.tanh %179 : vector<2x32xf32>
    %182 = arith.mulf %180, %181 : vector<2x32xf32>
    %c96 = arith.constant 96 : index
    %c0_33 = arith.constant 0 : index
    %183 = vector.load %arg5[%c96, %c0_33] : memref<256x128xf32, #tpu.memory_space<vmem>>, vector<32x128xf32>
    %cst_34 = arith.constant dense<0.000000e+00> : vector<2x128xf32>
    %184 = tpu.matmul %182, %183, %cst_34 {dimension_numbers = #tpu.dot_dimension_numbers<[1], [0], [0], [1], [0, 0, 1, 1], [], []>} : vector<2x32xf32>, vector<32x128xf32>, vector<2x128xf32> -> vector<2x128xf32>
    %185 = arith.addf %142, %184 : vector<2x128xf32>
    %186 = vector.extract_strided_slice %6 {offsets = [4, 0, 0], sizes = [1, 2, 128], strides = [1, 1, 1]} : vector<8x2x128xf32> to vector<1x2x128xf32>
    %187 = vector.shape_cast %186 : vector<1x2x128xf32> to vector<2x128xf32>
    %188 = arith.addf %187, %164 : vector<2x128xf32>
    %189 = arith.negf %188 : vector<2x128xf32>
    %190 = math.exp %189 : vector<2x128xf32>
    %cst_35 = arith.constant 1.000000e+00 : f32
    %191 = vector.broadcast %cst_35 : f32 to vector<2x128xf32>
    %192 = arith.addf %191, %190 : vector<2x128xf32>
    %193 = arith.divf %191, %192 : vector<2x128xf32>
    %194 = math.tanh %188 : vector<2x128xf32>
    %195 = vector.extract_strided_slice %193 {offsets = [0, 32], sizes = [2, 32], strides = [1, 1]} : vector<2x128xf32> to vector<2x32xf32>
    %196 = arith.mulf %195, %157 : vector<2x32xf32>
    %197 = vector.extract_strided_slice %193 {offsets = [0, 0], sizes = [2, 32], strides = [1, 1]} : vector<2x128xf32> to vector<2x32xf32>
    %198 = vector.extract_strided_slice %194 {offsets = [0, 64], sizes = [2, 32], strides = [1, 1]} : vector<2x128xf32> to vector<2x32xf32>
    %199 = arith.mulf %197, %198 : vector<2x32xf32>
    %200 = arith.addf %196, %199 : vector<2x32xf32>
    %201 = vector.extract_strided_slice %193 {offsets = [0, 96], sizes = [2, 32], strides = [1, 1]} : vector<2x128xf32> to vector<2x32xf32>
    %202 = math.tanh %200 : vector<2x32xf32>
    %203 = arith.mulf %201, %202 : vector<2x32xf32>
    %204 = tpu.concatenate %203, %182 in 1 : vector<2x32xf32>, vector<2x32xf32> -> vector<2x64xf32>
    %205 = arith.truncf %204 : vector<2x64xf32> to vector<2x64xbf16>
    %cst_36 = arith.constant dense<0.000000e+00> : vector<2x256xf32>
    %206 = tpu.matmul %205, %7, %cst_36 {dimension_numbers = #tpu.dot_dimension_numbers<[1], [0], [0], [1], [0, 0, 1, 1], [], []>} : vector<2x64xbf16>, vector<64x256xbf16>, vector<2x256xf32> -> vector<2x256xf32>
    %207 = vector.extract_strided_slice %206 {offsets = [0, 0], sizes = [2, 128], strides = [1, 1]} : vector<2x256xf32> to vector<2x128xf32>
    %208 = vector.extract_strided_slice %206 {offsets = [0, 128], sizes = [2, 128], strides = [1, 1]} : vector<2x256xf32> to vector<2x128xf32>
    %209 = vector.broadcast %8 : vector<1x128xf32> to vector<2x128xf32>
    %210 = arith.addf %208, %209 : vector<2x128xf32>
    %211 = arith.negf %210 : vector<2x128xf32>
    %212 = math.exp %211 : vector<2x128xf32>
    %cst_37 = arith.constant 1.000000e+00 : f32
    %213 = vector.broadcast %cst_37 : f32 to vector<2x128xf32>
    %214 = arith.addf %213, %212 : vector<2x128xf32>
    %215 = arith.divf %213, %214 : vector<2x128xf32>
    %216 = math.tanh %210 : vector<2x128xf32>
    %217 = vector.extract_strided_slice %215 {offsets = [0, 32], sizes = [2, 32], strides = [1, 1]} : vector<2x128xf32> to vector<2x32xf32>
    %218 = arith.mulf %217, %179 : vector<2x32xf32>
    %219 = vector.extract_strided_slice %215 {offsets = [0, 0], sizes = [2, 32], strides = [1, 1]} : vector<2x128xf32> to vector<2x32xf32>
    %220 = vector.extract_strided_slice %216 {offsets = [0, 64], sizes = [2, 32], strides = [1, 1]} : vector<2x128xf32> to vector<2x32xf32>
    %221 = arith.mulf %219, %220 : vector<2x32xf32>
    %222 = arith.addf %218, %221 : vector<2x32xf32>
    %223 = vector.extract_strided_slice %215 {offsets = [0, 96], sizes = [2, 32], strides = [1, 1]} : vector<2x128xf32> to vector<2x32xf32>
    %224 = math.tanh %222 : vector<2x32xf32>
    %225 = arith.mulf %223, %224 : vector<2x32xf32>
    %c128 = arith.constant 128 : index
    %c0_38 = arith.constant 0 : index
    %226 = vector.load %arg5[%c128, %c0_38] : memref<256x128xf32, #tpu.memory_space<vmem>>, vector<32x128xf32>
    %cst_39 = arith.constant dense<0.000000e+00> : vector<2x128xf32>
    %227 = tpu.matmul %225, %226, %cst_39 {dimension_numbers = #tpu.dot_dimension_numbers<[1], [0], [0], [1], [0, 0, 1, 1], [], []>} : vector<2x32xf32>, vector<32x128xf32>, vector<2x128xf32> -> vector<2x128xf32>
    %228 = arith.addf %185, %227 : vector<2x128xf32>
    %229 = vector.extract_strided_slice %6 {offsets = [5, 0, 0], sizes = [1, 2, 128], strides = [1, 1, 1]} : vector<8x2x128xf32> to vector<1x2x128xf32>
    %230 = vector.shape_cast %229 : vector<1x2x128xf32> to vector<2x128xf32>
    %231 = arith.addf %230, %207 : vector<2x128xf32>
    %232 = arith.negf %231 : vector<2x128xf32>
    %233 = math.exp %232 : vector<2x128xf32>
    %cst_40 = arith.constant 1.000000e+00 : f32
    %234 = vector.broadcast %cst_40 : f32 to vector<2x128xf32>
    %235 = arith.addf %234, %233 : vector<2x128xf32>
    %236 = arith.divf %234, %235 : vector<2x128xf32>
    %237 = math.tanh %231 : vector<2x128xf32>
    %238 = vector.extract_strided_slice %236 {offsets = [0, 32], sizes = [2, 32], strides = [1, 1]} : vector<2x128xf32> to vector<2x32xf32>
    %239 = arith.mulf %238, %200 : vector<2x32xf32>
    %240 = vector.extract_strided_slice %236 {offsets = [0, 0], sizes = [2, 32], strides = [1, 1]} : vector<2x128xf32> to vector<2x32xf32>
    %241 = vector.extract_strided_slice %237 {offsets = [0, 64], sizes = [2, 32], strides = [1, 1]} : vector<2x128xf32> to vector<2x32xf32>
    %242 = arith.mulf %240, %241 : vector<2x32xf32>
    %243 = arith.addf %239, %242 : vector<2x32xf32>
    %244 = vector.extract_strided_slice %236 {offsets = [0, 96], sizes = [2, 32], strides = [1, 1]} : vector<2x128xf32> to vector<2x32xf32>
    %245 = math.tanh %243 : vector<2x32xf32>
    %246 = arith.mulf %244, %245 : vector<2x32xf32>
    %247 = tpu.concatenate %246, %225 in 1 : vector<2x32xf32>, vector<2x32xf32> -> vector<2x64xf32>
    %248 = arith.truncf %247 : vector<2x64xf32> to vector<2x64xbf16>
    %cst_41 = arith.constant dense<0.000000e+00> : vector<2x256xf32>
    %249 = tpu.matmul %248, %7, %cst_41 {dimension_numbers = #tpu.dot_dimension_numbers<[1], [0], [0], [1], [0, 0, 1, 1], [], []>} : vector<2x64xbf16>, vector<64x256xbf16>, vector<2x256xf32> -> vector<2x256xf32>
    %250 = vector.extract_strided_slice %249 {offsets = [0, 0], sizes = [2, 128], strides = [1, 1]} : vector<2x256xf32> to vector<2x128xf32>
    %251 = vector.extract_strided_slice %249 {offsets = [0, 128], sizes = [2, 128], strides = [1, 1]} : vector<2x256xf32> to vector<2x128xf32>
    %252 = vector.broadcast %8 : vector<1x128xf32> to vector<2x128xf32>
    %253 = arith.addf %251, %252 : vector<2x128xf32>
    %254 = arith.negf %253 : vector<2x128xf32>
    %255 = math.exp %254 : vector<2x128xf32>
    %cst_42 = arith.constant 1.000000e+00 : f32
    %256 = vector.broadcast %cst_42 : f32 to vector<2x128xf32>
    %257 = arith.addf %256, %255 : vector<2x128xf32>
    %258 = arith.divf %256, %257 : vector<2x128xf32>
    %259 = math.tanh %253 : vector<2x128xf32>
    %260 = vector.extract_strided_slice %258 {offsets = [0, 32], sizes = [2, 32], strides = [1, 1]} : vector<2x128xf32> to vector<2x32xf32>
    %261 = arith.mulf %260, %222 : vector<2x32xf32>
    %262 = vector.extract_strided_slice %258 {offsets = [0, 0], sizes = [2, 32], strides = [1, 1]} : vector<2x128xf32> to vector<2x32xf32>
    %263 = vector.extract_strided_slice %259 {offsets = [0, 64], sizes = [2, 32], strides = [1, 1]} : vector<2x128xf32> to vector<2x32xf32>
    %264 = arith.mulf %262, %263 : vector<2x32xf32>
    %265 = arith.addf %261, %264 : vector<2x32xf32>
    %266 = vector.extract_strided_slice %258 {offsets = [0, 96], sizes = [2, 32], strides = [1, 1]} : vector<2x128xf32> to vector<2x32xf32>
    %267 = math.tanh %265 : vector<2x32xf32>
    %268 = arith.mulf %266, %267 : vector<2x32xf32>
    %c160 = arith.constant 160 : index
    %c0_43 = arith.constant 0 : index
    %269 = vector.load %arg5[%c160, %c0_43] : memref<256x128xf32, #tpu.memory_space<vmem>>, vector<32x128xf32>
    %cst_44 = arith.constant dense<0.000000e+00> : vector<2x128xf32>
    %270 = tpu.matmul %268, %269, %cst_44 {dimension_numbers = #tpu.dot_dimension_numbers<[1], [0], [0], [1], [0, 0, 1, 1], [], []>} : vector<2x32xf32>, vector<32x128xf32>, vector<2x128xf32> -> vector<2x128xf32>
    %271 = arith.addf %228, %270 : vector<2x128xf32>
    %272 = vector.extract_strided_slice %6 {offsets = [6, 0, 0], sizes = [1, 2, 128], strides = [1, 1, 1]} : vector<8x2x128xf32> to vector<1x2x128xf32>
    %273 = vector.shape_cast %272 : vector<1x2x128xf32> to vector<2x128xf32>
    %274 = arith.addf %273, %250 : vector<2x128xf32>
    %275 = arith.negf %274 : vector<2x128xf32>
    %276 = math.exp %275 : vector<2x128xf32>
    %cst_45 = arith.constant 1.000000e+00 : f32
    %277 = vector.broadcast %cst_45 : f32 to vector<2x128xf32>
    %278 = arith.addf %277, %276 : vector<2x128xf32>
    %279 = arith.divf %277, %278 : vector<2x128xf32>
    %280 = math.tanh %274 : vector<2x128xf32>
    %281 = vector.extract_strided_slice %279 {offsets = [0, 32], sizes = [2, 32], strides = [1, 1]} : vector<2x128xf32> to vector<2x32xf32>
    %282 = arith.mulf %281, %243 : vector<2x32xf32>
    %283 = vector.extract_strided_slice %279 {offsets = [0, 0], sizes = [2, 32], strides = [1, 1]} : vector<2x128xf32> to vector<2x32xf32>
    %284 = vector.extract_strided_slice %280 {offsets = [0, 64], sizes = [2, 32], strides = [1, 1]} : vector<2x128xf32> to vector<2x32xf32>
    %285 = arith.mulf %283, %284 : vector<2x32xf32>
    %286 = arith.addf %282, %285 : vector<2x32xf32>
    %287 = vector.extract_strided_slice %279 {offsets = [0, 96], sizes = [2, 32], strides = [1, 1]} : vector<2x128xf32> to vector<2x32xf32>
    %288 = math.tanh %286 : vector<2x32xf32>
    %289 = arith.mulf %287, %288 : vector<2x32xf32>
    %290 = tpu.concatenate %289, %268 in 1 : vector<2x32xf32>, vector<2x32xf32> -> vector<2x64xf32>
    %291 = arith.truncf %290 : vector<2x64xf32> to vector<2x64xbf16>
    %cst_46 = arith.constant dense<0.000000e+00> : vector<2x256xf32>
    %292 = tpu.matmul %291, %7, %cst_46 {dimension_numbers = #tpu.dot_dimension_numbers<[1], [0], [0], [1], [0, 0, 1, 1], [], []>} : vector<2x64xbf16>, vector<64x256xbf16>, vector<2x256xf32> -> vector<2x256xf32>
    %293 = vector.extract_strided_slice %292 {offsets = [0, 0], sizes = [2, 128], strides = [1, 1]} : vector<2x256xf32> to vector<2x128xf32>
    %294 = vector.extract_strided_slice %292 {offsets = [0, 128], sizes = [2, 128], strides = [1, 1]} : vector<2x256xf32> to vector<2x128xf32>
    %295 = vector.broadcast %8 : vector<1x128xf32> to vector<2x128xf32>
    %296 = arith.addf %294, %295 : vector<2x128xf32>
    %297 = arith.negf %296 : vector<2x128xf32>
    %298 = math.exp %297 : vector<2x128xf32>
    %cst_47 = arith.constant 1.000000e+00 : f32
    %299 = vector.broadcast %cst_47 : f32 to vector<2x128xf32>
    %300 = arith.addf %299, %298 : vector<2x128xf32>
    %301 = arith.divf %299, %300 : vector<2x128xf32>
    %302 = math.tanh %296 : vector<2x128xf32>
    %303 = vector.extract_strided_slice %301 {offsets = [0, 32], sizes = [2, 32], strides = [1, 1]} : vector<2x128xf32> to vector<2x32xf32>
    %304 = arith.mulf %303, %265 : vector<2x32xf32>
    %305 = vector.extract_strided_slice %301 {offsets = [0, 0], sizes = [2, 32], strides = [1, 1]} : vector<2x128xf32> to vector<2x32xf32>
    %306 = vector.extract_strided_slice %302 {offsets = [0, 64], sizes = [2, 32], strides = [1, 1]} : vector<2x128xf32> to vector<2x32xf32>
    %307 = arith.mulf %305, %306 : vector<2x32xf32>
    %308 = arith.addf %304, %307 : vector<2x32xf32>
    %309 = vector.extract_strided_slice %301 {offsets = [0, 96], sizes = [2, 32], strides = [1, 1]} : vector<2x128xf32> to vector<2x32xf32>
    %310 = math.tanh %308 : vector<2x32xf32>
    %311 = arith.mulf %309, %310 : vector<2x32xf32>
    %c192 = arith.constant 192 : index
    %c0_48 = arith.constant 0 : index
    %312 = vector.load %arg5[%c192, %c0_48] : memref<256x128xf32, #tpu.memory_space<vmem>>, vector<32x128xf32>
    %cst_49 = arith.constant dense<0.000000e+00> : vector<2x128xf32>
    %313 = tpu.matmul %311, %312, %cst_49 {dimension_numbers = #tpu.dot_dimension_numbers<[1], [0], [0], [1], [0, 0, 1, 1], [], []>} : vector<2x32xf32>, vector<32x128xf32>, vector<2x128xf32> -> vector<2x128xf32>
    %314 = arith.addf %271, %313 : vector<2x128xf32>
    %315 = vector.extract_strided_slice %6 {offsets = [7, 0, 0], sizes = [1, 2, 128], strides = [1, 1, 1]} : vector<8x2x128xf32> to vector<1x2x128xf32>
    %316 = vector.shape_cast %315 : vector<1x2x128xf32> to vector<2x128xf32>
    %317 = arith.addf %316, %293 : vector<2x128xf32>
    %318 = arith.negf %317 : vector<2x128xf32>
    %319 = math.exp %318 : vector<2x128xf32>
    %cst_50 = arith.constant 1.000000e+00 : f32
    %320 = vector.broadcast %cst_50 : f32 to vector<2x128xf32>
    %321 = arith.addf %320, %319 : vector<2x128xf32>
    %322 = arith.divf %320, %321 : vector<2x128xf32>
    %323 = math.tanh %317 : vector<2x128xf32>
    %324 = vector.extract_strided_slice %322 {offsets = [0, 32], sizes = [2, 32], strides = [1, 1]} : vector<2x128xf32> to vector<2x32xf32>
    %325 = arith.mulf %324, %286 : vector<2x32xf32>
    %326 = vector.extract_strided_slice %322 {offsets = [0, 0], sizes = [2, 32], strides = [1, 1]} : vector<2x128xf32> to vector<2x32xf32>
    %327 = vector.extract_strided_slice %323 {offsets = [0, 64], sizes = [2, 32], strides = [1, 1]} : vector<2x128xf32> to vector<2x32xf32>
    %328 = arith.mulf %326, %327 : vector<2x32xf32>
    %329 = arith.addf %325, %328 : vector<2x32xf32>
    %330 = vector.extract_strided_slice %322 {offsets = [0, 96], sizes = [2, 32], strides = [1, 1]} : vector<2x128xf32> to vector<2x32xf32>
    %331 = math.tanh %329 : vector<2x32xf32>
    %332 = arith.mulf %330, %331 : vector<2x32xf32>
    %333 = tpu.concatenate %332, %311 in 1 : vector<2x32xf32>, vector<2x32xf32> -> vector<2x64xf32>
    %334 = arith.truncf %333 : vector<2x64xf32> to vector<2x64xbf16>
    %cst_51 = arith.constant dense<0.000000e+00> : vector<2x256xf32>
    %335 = tpu.matmul %334, %7, %cst_51 {dimension_numbers = #tpu.dot_dimension_numbers<[1], [0], [0], [1], [0, 0, 1, 1], [], []>} : vector<2x64xbf16>, vector<64x256xbf16>, vector<2x256xf32> -> vector<2x256xf32>
    %336 = vector.extract_strided_slice %335 {offsets = [0, 128], sizes = [2, 128], strides = [1, 1]} : vector<2x256xf32> to vector<2x128xf32>
    %337 = vector.broadcast %8 : vector<1x128xf32> to vector<2x128xf32>
    %338 = arith.addf %336, %337 : vector<2x128xf32>
    %339 = arith.negf %338 : vector<2x128xf32>
    %340 = math.exp %339 : vector<2x128xf32>
    %cst_52 = arith.constant 1.000000e+00 : f32
    %341 = vector.broadcast %cst_52 : f32 to vector<2x128xf32>
    %342 = arith.addf %341, %340 : vector<2x128xf32>
    %343 = arith.divf %341, %342 : vector<2x128xf32>
    %344 = math.tanh %338 : vector<2x128xf32>
    %345 = vector.extract_strided_slice %343 {offsets = [0, 32], sizes = [2, 32], strides = [1, 1]} : vector<2x128xf32> to vector<2x32xf32>
    %346 = arith.mulf %345, %308 : vector<2x32xf32>
    %347 = vector.extract_strided_slice %343 {offsets = [0, 0], sizes = [2, 32], strides = [1, 1]} : vector<2x128xf32> to vector<2x32xf32>
    %348 = vector.extract_strided_slice %344 {offsets = [0, 64], sizes = [2, 32], strides = [1, 1]} : vector<2x128xf32> to vector<2x32xf32>
    %349 = arith.mulf %347, %348 : vector<2x32xf32>
    %350 = arith.addf %346, %349 : vector<2x32xf32>
    %351 = vector.extract_strided_slice %343 {offsets = [0, 96], sizes = [2, 32], strides = [1, 1]} : vector<2x128xf32> to vector<2x32xf32>
    %352 = math.tanh %350 : vector<2x32xf32>
    %353 = arith.mulf %351, %352 : vector<2x32xf32>
    %c224 = arith.constant 224 : index
    %c0_53 = arith.constant 0 : index
    %354 = vector.load %arg5[%c224, %c0_53] : memref<256x128xf32, #tpu.memory_space<vmem>>, vector<32x128xf32>
    %cst_54 = arith.constant dense<0.000000e+00> : vector<2x128xf32>
    %355 = tpu.matmul %353, %354, %cst_54 {dimension_numbers = #tpu.dot_dimension_numbers<[1], [0], [0], [1], [0, 0, 1, 1], [], []>} : vector<2x32xf32>, vector<32x128xf32>, vector<2x128xf32> -> vector<2x128xf32>
    %356 = arith.addf %314, %355 : vector<2x128xf32>
    %c0_55 = arith.constant 0 : index
    %c0_56 = arith.constant 0 : index
    %357 = vector.load %arg6[%c0_55, %c0_56] : memref<1x128xf32, #tpu.memory_space<vmem>>, vector<1x128xf32>
    %358 = vector.broadcast %357 : vector<1x128xf32> to vector<2x128xf32>
    %359 = arith.addf %356, %358 : vector<2x128xf32>
    %c0_57 = arith.constant 0 : index
    %c0_58 = arith.constant 0 : index
    %360 = vector.load %arg7[%c0_57, %c0_58] : memref<2x128xf32, #tpu.memory_space<vmem>>, vector<2x128xf32>
    tpu.vector_store %arg7[%c0_57, %c0_58], %359 {strides = array<i32>} : memref<2x128xf32, #tpu.memory_space<vmem>>, vector<2x128xf32>,
    return
  }
}

</mosaic_0001>

<bundles_post_ra>
// kernel: model_mnist_forward.1
= control target key start
LH: loop header
LB: loop body
LE: loop exit
PB: predicated region body
PF: predicated region fallthrough
CT: control target
= control target key end

     0   :  { %12 = vsyncpa [#allocation3], 0  ;;  %s2692_s0 = inlined_call_operand.vmem [shape: f32[16,16], index: 0, kind: input, shape index: {}]   ;;  %s2693_s1 = inlined_call_operand.vmem [shape: f32[16,128], index: 1, kind: input, shape index: {}]   ;;  %s2694_s2 = inlined_call_operand.vmem [shape: f32[1,128], index: 2, kind: input, shape index: {}]   ;;  %s2695_s3 = inlined_call_operand.hbm [shape: bf16[64,256], index: 3, kind: input, shape index: {}]   ;;  %s2696_s4 = inlined_call_operand.vmem [shape: f32[1,128], index: 4, kind: input, shape index: {}]   ;;  %s2697_s5 = inlined_call_operand.hbm [shape: f32[256,128], index: 5, kind: input, shape index: {}]   ;;  %s2698_s6 = inlined_call_operand.vmem [shape: f32[1,128], index: 6, kind: input, shape index: {}]   ;;  %s2699_s7 = inlined_call_operand.hbm [shape: f32[2,128], index: 7, kind: output, shape index: {}]  }
   0x1   :  { %13 = vsyncpa [#allocation6], 0 }
   0x2   :  { %14 = vsyncpa [#allocation4], 0  ;;  %s2258_s24 = smov [#allocation2]   ;;  %s2186_s28 = scalar_lea.hbm %s2695_s3, 1024 }
   0x3   :  { %s26_s25 = sshll.u32 %s2258_s24, 4  ;;  %p2187_p0 = scmp.ne.s32.totalorder %s2695_s3, %s2186_s28  ;;  %s27_s25 = int_to_ptr.vmem [resolvable:$true] %s26_s25 }
   0x4   :  { %p2190_p1 = scmp.lt.u32.totalorder %s2186_s28, %s2695_s3 }
   0x6   :  { %p2192_p2 = pnand %p2190_p1, %p2187_p0 }
   0x8   :  { %2195 = shalt.err (!%p2192_p2)
}
   0x9   :  { %s2196_s10 = scalar_lea.vmem %s27_s25, 1024  ;;  %p2201_p4 = scmp.lt.s32.totalorder %s27_s25, %s27_s25 }
   0xa   :  { %p2197_p3 = scmp.ne.s32.totalorder %s27_s25, %s2196_s10  ;;  %p2202_p5 = scmp.lt.s32.totalorder %s2196_s10, %s2196_s10 }
   0xc   :  { %p2203_p6 = por %p2202_p5, %p2201_p4 }
   0xe   :  { %p2204_p7 = pnand %p2203_p6, %p2197_p3 }
  0x10   :  { %2207 = shalt.err (!%p2204_p7)
}
  0x11   :  { %s2259_s11 = smov 128   ;;  %s2260_s12 = smov 8  }
  0x12   :  { %32 = dma.hbm_to_vmem [thread:$0]  %s2695_s3, 1024, %s27_s25, [#allocation3], %s2259_s11, %s2259_s11, %s2260_s12  }
  0x13   :  { %s2261_s15 = smov [#allocation5]   ;;  %s2208_s19 = scalar_lea.hbm %s2697_s5, 4096 }
  0x14   :  { %s40_s16 = sshll.u32 %s2261_s15, 4  ;;  %p2209_p8 = scmp.ne.s32.totalorder %s2697_s5, %s2208_s19  ;;  %s41_s16 = int_to_ptr.vmem [resolvable:$true] %s40_s16 }
  0x15   :  { %p2212_p9 = scmp.lt.u32.totalorder %s2208_s19, %s2697_s5 }
  0x17   :  { %p2214_p10 = pnand %p2212_p9, %p2209_p8 }
  0x19   :  { %2217 = shalt.err (!%p2214_p10)
}
  0x1a   :  { %s2218_s24 = scalar_lea.vmem %s41_s16, 4096  ;;  %p2223_p12 = scmp.lt.s32.totalorder %s41_s16, %s41_s16 }
  0x1b   :  { %p2219_p11 = scmp.ne.s32.totalorder %s41_s16, %s2218_s24  ;;  %p2224_p13 = scmp.lt.s32.totalorder %s2218_s24, %s2218_s24 }
  0x1d   :  { %p2225_p0 = por %p2224_p13, %p2223_p12 }
  0x1f   :  { %p2226_p1 = pnand %p2225_p0, %p2219_p11 }
  0x21   :  { %2229 = shalt.err (!%p2226_p1)
}
  0x22   :  { %46 = dma.hbm_to_vmem [thread:$0]  %s2697_s5, 4096, %s41_s16, [#allocation6], %s2259_s11, %s2259_s11, %s2260_s12  }
  0x23   :  { %2252 = dma.done.wait [#allocation3], 1024  }
  0x24   :  { %2253 = vsyncadd [#allocation3], 4294966272 }
  0x25   :  { %2254 = dma.done.wait [#allocation6], 4096  }
  0x26   :  { %2255 = vsyncadd [#allocation6], 4294963200  ;;  %vm67_vm0 = vcmask 130048   ;;  %v58_v0 = vld [vmem:[%s2693_s1] sm:$0xff]  ;;  %v59_v1 = vld [vmem:[%s2693_s1 + $0x8] sm:$0xff]  ;;  %v155_v7 = vlaneseq  ;;  %v2265_v36 = vmov 0  }
  0x27   :  { %v56_v2 = vld [vmem:[%s2692_s0] sm:$0xff]  ;;  %v1973_v3 = vpack.c.bf16 %v59_v1, %v58_v0  ;;  %v57_v4 = vld [vmem:[%s2692_s0 + $0x8] sm:$0xff]  ;;  %v2262_v5 = vmov 1983009808   ;;  %s2263_s0 = smov 64   ;;  %438 = vmatprep.mubr.bf16.mxu0 %v2265_v36  ;;  %vm238_vm1 = vcmask 261120  }
  0x28   :  { %1882 = vmatprep.mubr.msk.f32.mxu1 %vm67_vm0, %v56_v2  ;;  %v153_v6 = vunpack.c.l.s4 %v2262_v5  ;;  %v156_v9 = vshrl.u32 %v155_v7, 7  ;;  %v1789_v10 = vld [vmem:[%s2694_s2] ss:$0 sm:$0xff]  ;;  %s2264_s2 = smov 32   ;;  %v2362_v27 = vld [vmem:[#allocation2 + $0x4] ss:$8 sps:$4 sm:$0xff]  }
  0x29   :  { %1974 = vmatprep.subr.bf16.mxu1 %v1973_v3  ;;  %v2364_v28 = vld [vmem:[#allocation2] ss:$8 sps:$4 sm:$0xff]   ;;  %v2366_v29 = vld [vmem:[#allocation2 + $0x14] ss:$8 sps:$4 sm:$0xff]   ;;  %406 = vmatprep.subr.bf16.mxu0 %v2362_v27  ;;  %v2371_v30 = vld [vmem:[#allocation2 + $0x10] ss:$8 sps:$4 sm:$0xff]  }
  0x2a   :  { %1976 = vmatpush3.bf16.msra.mxu1 %v1973_v3  ;;  %v154_v8 = vunpack.c.0.s8 %v153_v6  ;;  %407 = vmatpush1.bf16.msra.mxu0 %v2364_v28  ;;  %v2375_v31 = vld [vmem:[#allocation2 + $0x24] ss:$8 sps:$4 sm:$0xff]   ;;  %v2379_v32 = vld [vmem:[#allocation2 + $0x20] ss:$8 sps:$4 sm:$0xff]   ;;  %v2383_v34 = vld [vmem:[#allocation2 + $0x34] ss:$8 sps:$4 sm:$0xff]  }
  0x2b   :  { %285 = vmatprep.subr.bf16.mxu1 %v2362_v27  ;;  %408 = vmatprep.subr.bf16.mxu0 %v2366_v29  ;;  %v2391_v35 = vld [vmem:[#allocation2 + $0x30] ss:$8 sps:$4 sm:$0xff]   ;;  %vm281_vm2 = vcmask 523264   ;;  %v2404_v44 = vld [vmem:[%s2696_s4] ss:$0 sm:$0xff]  ;;  %vm2267_vm3 = vmmov 0  }
  0x2c   :  { %v2349_v12 = vsub.s32 %v154_v8, %v156_v9  ;;  %s2269_s16 = smov [#allocation7]  }
  0x2d   :  { %1883 = vmatmul.mubr.msk.f32.vlgmr.msra.gmra.mrb[0].mxu1 %vm67_vm0, %v57_v4  ;;  %s1779_s17 = sshll.u32 %s2269_s16, 4  ;;  %s1780_s17 = int_to_ptr.vmem [resolvable:$true] %s1779_s17 }
  0x2e   :  { %286 = vmatpush1.bf16.msra.mxu1 %v2364_v28  ;;  %409 = vmatpush1.bf16.msra.mxu0 %v2371_v30  ;;  %s2230_s18 = scalar_lea.vmem %s1780_s17, 32  ;;  %p2235_p3 = scmp.lt.s32.totalorder %s1780_s17, %s1780_s17 }
  0x2f   :  { %287 = vmatprep.subr.bf16.mxu1 %v2366_v29  ;;  %410 = vmatprep.subr.bf16.mxu0 %v2375_v31  ;;  %p2231_p2 = scmp.ne.s32.totalorder %s1780_s17, %s2230_s18  ;;  %p2236_p4 = scmp.lt.s32.totalorder %s2230_s18, %s2230_s18 }
  0x30   :  { %317 = vmatprep.mubr.bf16.mxu1 %v2265_v36 }
  0x31   :  { %p2237_p5 = por %p2236_p4, %p2235_p3 }
  0x32   :  { %288 = vmatpush1.bf16.msra.mxu1 %v2371_v30  ;;  %411 = vmatpush1.bf16.msra.mxu0 %v2379_v32 }
  0x33   :  { %289 = vmatprep.subr.bf16.mxu1 %v2375_v31  ;;  %412 = vmatprep.subr.bf16.mxu0 %v2383_v34  ;;  %p2238_p6 = pnand %p2237_p5, %p2231_p2 }
  0x36   :  { %290 = vmatpush1.bf16.msra.mxu1 %v2379_v32  ;;  %413 = vmatpush1.bf16.msra.mxu0 %v2391_v35 }
  0x37   :  { %291 = vmatprep.subr.bf16.mxu1 %v2383_v34 }
  0x3a   :  { %292 = vmatpush1.bf16.msra.mxu1 %v2391_v35 }
 0x100   :  { %v1884_v11 = vpop.f32.mrb[0].mxu1 }
 0x101   :  { %v2351_v13 = vadd.f32 %v1884_v11, %v1789_v10  ;;  %v140_v14 = vpop.f32.mrb[1].mxu1 }
 0x102   :  { %v2353_v15 = vadd.f32 %v1789_v10, %v140_v14 }
 0x104   :  { %v158_v16 = vrot.slane %v2353_v15, %v2349_v12 }
 0x106   :  { %2049 = vtanh.f32 %v158_v16  ;;  %v1792_v18 = vmul.f32 -1.442695, %v158_v16  ;;  %v166_v43 = vcombine.high %v158_v16, %v158_v16 }
 0x108   :  { %2051 = vpow2.f32 %v1792_v18 }
 0x110   :  { %v2050_v17 = vpop.eup %2049 }
 0x111   :  { %212 = vrot.lane.b32.xlu0 %v2050_v17, %s2263_s0 }
 0x112   :  { %v2052_v19 = vpop.eup %2051 }
 0x113   :  { %v206_v20 = vadd.f32 1.0, %v2052_v19 }
 0x115   :  { %2053 = vrcp.f32 %v206_v20 }
 0x11f   :  { %v2054_v21 = vpop.eup %2053 }
 0x120   :  { %v210_v24 = vmul.f32 0.0, %v2054_v21 }
 0x183   :  { %v213_v22 = vpop.permute.xlu0 %212 }
 0x184   :  { %v215_v23 = vmul.f32 %v2054_v21, %v213_v22 }
 0x186   :  { %217 = vrot.lane.b32.xlu0 %v215_v23, %s2264_s2 }
 0x1f8   :  { %v218_v25 = vpop.permute.xlu0 %217 }
 0x1f9   :  { %v2359_v26 = vadd.f32 %v218_v25, %v210_v24 }
 0x1fb   :  { %2055 = vtanh.f32 %v2359_v26 }
 0x205   :  { %v2056_v33 = vpop.eup %2055 }
 0x206   :  { %223 = vrot.lane.b32.xlu1 %v2056_v33, %s2263_s0 }
 0x278   :  { %v224_v37 = vpop.permute.xlu1 %223 }
 0x279   :  { %v226_v38 = vmul.f32 %v2054_v21, %v224_v37  ;;  %v151_v21 = vcombine.high %v2353_v15, %v2353_v15 }
 0x27b   :  { %v234_v39 = vrot.slane %v226_v38, %v2349_v12  ;;  %v2425_v22 = vrot.slane %v151_v21, %v2349_v12 }
 0x27d   :  { %235 = vrot.lane.b32.xlu1 %v234_v39, %s2264_s2 }
 0x2ef   :  { %v236_v40 = vpop.permute.xlu1 %235 }
 0x2f0   :  { %v239_v41 = vsel %vm238_vm1, %v236_v40, 0.0 }
 0x2f1   :  { %v240_v42 = vpack.c.bf16 %v239_v41, %v239_v41 }
 0x2f3   :  { %1801 = vmatmul.mubr.msk.bf16.vlgmr.msra.gmra.mrb[4].mxu1 %vm281_vm2, %v240_v42 }
 0x3c6   :  { %v319_v45 = vpop.f32.mrb[4].mxu1 }
 0x3c7   :  { %v361_v46 = vadd.f32 %v319_v45, %v166_v43  ;;  %v321_v47 = vpop.f32.mrb[5].mxu1 }
 0x3c8   :  { %v332_v48 = vadd.f32 %v2404_v44, %v321_v47  ;;  %v323_v49 = vpop.f32.mrb[6].mxu1 }
 0x3c9   :  { %2057 = vtanh.f32 %v361_v46  ;;  %v324_v50 = vpop.f32.mrb[7].mxu1  ;;  %v1804_v53 = vmul.f32 -1.442695, %v361_v46 }
 0x3ca   :  { %2059 = vtanh.f32 %v332_v48  ;;  %v1803_v54 = vmul.f32 -1.442695, %v332_v48 }
 0x3cb   :  { %2061 = vpow2.f32 %v1804_v53 }
 0x3cc   :  { %2063 = vpow2.f32 %v1803_v54 }
 0x3d3   :  { %v2058_v51 = vpop.eup %2057 }
 0x3d4   :  { %v2060_v52 = vpop.eup %2059  ;;  %371 = vrot.lane.b32.xlu0 %v2058_v51, %s2263_s0 }
 0x3d5   :  { %342 = vrot.lane.b32.xlu1 %v2060_v52, %s2263_s0  ;;  %v2062_v55 = vpop.eup %2061 }
 0x3d6   :  { %v2064_v56 = vpop.eup %2063  ;;  %v365_v57 = vadd.f32 1.0, %v2062_v55 }
 0x3d7   :  { %v336_v58 = vadd.f32 1.0, %v2064_v56 }
 0x3d8   :  { %2065 = vrcp.f32 %v365_v57 }
 0x3d9   :  { %2067 = vrcp.f32 %v336_v58  ;;  %v472_v58 = vld [vmem:[#allocation5 + $0x20] sm:$0xff] }
 0x3e2   :  { %v2066_v59 = vpop.eup %2065 }
 0x3e3   :  { %v2068_v61 = vpop.eup %2067  ;;  %v369_v1 = vmul.f32 %v2066_v59, %v2359_v26 }
 0x3e4   :  { %v340_v3 = vmul.f32 0.0, %v2068_v61 }
 0x446   :  { %v372_v60 = vpop.permute.xlu0 %371 }
 0x447   :  { %v374_v62 = vmul.f32 %v2066_v59, %v372_v60  ;;  %v343_v63 = vpop.permute.xlu1 %342  ;;  %v474_v60 = vld [vmem:[#allocation5 + $0x30] sm:$0xff] }
 0x448   :  { %v345_v0 = vmul.f32 %v2068_v61, %v343_v63  ;;  %v475_v63 = vld [vmem:[#allocation5 + $0x38] sm:$0xff] }
 0x449   :  { %376 = vrot.lane.b32.xlu0 %v374_v62, %s2264_s2 }
 0x44a   :  { %347 = vrot.lane.b32.xlu1 %v345_v0, %s2264_s2  ;;  %v2268_v0 = vmov 0.0  }
 0x44b   :  { %1893 = vmatprep.mubr.msk.f32.mxu1 %vm2267_vm3, %v2268_v0 }
 0x4bb   :  { %v377_v2 = vpop.permute.xlu0 %376 }
 0x4bc   :  { %v379_v4 = vadd.f32 %v377_v2, %v369_v1  ;;  %v348_v5 = vpop.permute.xlu1 %347  ;;  %v1981_v1 = vpack.c.bf16 %v475_v63, %v474_v60 }
 0x4bd   :  { %v350_v6 = vadd.f32 %v348_v5, %v340_v3 }
 0x4be   :  { %2069 = vtanh.f32 %v379_v4 }
 0x4bf   :  { %2071 = vtanh.f32 %v350_v6 }
 0x4c8   :  { %v2070_v7 = vpop.eup %2069 }
 0x4c9   :  { %v2072_v8 = vpop.eup %2071  ;;  %382 = vrot.lane.b32.xlu0 %v2070_v7, %s2263_s0 }
 0x4ca   :  { %353 = vrot.lane.b32.xlu1 %v2072_v8, %s2263_s0 }
 0x53b   :  { %v383_v9 = vpop.permute.xlu0 %382 }
 0x53c   :  { %v385_v10 = vmul.f32 %v2066_v59, %v383_v9  ;;  %v354_v11 = vpop.permute.xlu1 %353  ;;  %v473_v59 = vld [vmem:[#allocation5 + $0x28] sm:$0xff] }
 0x53d   :  { %v2414_v14 = vmul.f32 %v2068_v61, %v354_v11  ;;  %v2266_v61 = vmov 0.0|0.0   ;;  %v1978_v62 = vpack.c.bf16 %v473_v59, %v472_v58  ;;  %v359_v58 = vld [vmem:[#allocation5 + $0x10] sm:$0xff]  ;;  %v360_v59 = vld [vmem:[#allocation5 + $0x18] sm:$0xff] }
 0x53e   :  { %v393_v16 = vrot.slane %v385_v10, %v2349_v12  ;;  %1977 = vmatprep.subr.bf16.mxu1 %v2266_v61  ;;  %1983 = vmatprep.subr.bf16.mxu0 %v2266_v61  ;;  %v1987_v63 = vpack.c.bf16 %v360_v59, %v359_v58 }
 0x53f   :  { %398 = vrot.lane.b32.xlu1 %v2414_v14, %s2263_s0  ;;  %1979 = vmatpush3.bf16.msra.mxu1 %v1978_v62 }
 0x540   :  { %394 = vrot.lane.b32.xlu0 %v393_v16, %s2264_s2  ;;  %1980 = vmatprep.subr.bf16.mxu1 %v2266_v61 }
 0x543   :  { %1982 = vmatpush3.bf16.msra.mxu1 %v1981_v1 }
 0x544   :  { %669 = vmatprep.subr.bf16.mxu1 %v2362_v27 }
 0x5b1   :  { %v399_v17 = vpop.permute.xlu1 %398 }
 0x5b2   :  { %v395_v18 = vpop.permute.xlu0 %394 }
 0x5b3   :  { %v401_v19 = vsel %vm238_vm1, %v395_v18, %v399_v17 }
 0x5b4   :  { %v402_v20 = vpack.c.bf16 %v401_v19, %v401_v19 }
 0x5b6   :  { %1805 = vmatmul.mubr.msk.bf16.vlgmr.msra.gmra.mrb[0].mxu0 %vm281_vm2, %v402_v20  ;;  %v167_v20 = vcombine.high %v2425_v22, %v2425_v22 }
 0x5b7   :  { %1904 = vmatprep.mubr.msk.f32.mxu0 %vm2267_vm3, %v2268_v0 }
 0x689   :  { %v440_v23 = vpop.f32.mrb[0].mxu0 }
 0x68a   :  { %v625_v24 = vadd.f32 %v440_v23, %v2425_v22  ;;  %v442_v25 = vpop.f32.mrb[1].mxu0 }
 0x68b   :  { %v447_v26 = vadd.f32 %v2404_v44, %v442_v25  ;;  %v444_v33 = vpop.f32.mrb[2].mxu0 }
 0x68c   :  { %2073 = vtanh.f32 %v625_v24  ;;  %v445_v37 = vpop.f32.mrb[3].mxu0  ;;  %v1809_v15 = vmul.f32 -1.442695, %v625_v24 }
 0x68d   :  { %2075 = vtanh.f32 %v447_v26  ;;  %v1806_v40 = vmul.f32 -1.442695, %v447_v26 }
 0x68e   :  { %2077 = vpow2.f32 %v1809_v15 }
 0x68f   :  { %2079 = vpow2.f32 %v1806_v40 }
 0x696   :  { %v2074_v38 = vpop.eup %2073 }
 0x697   :  { %v2076_v39 = vpop.eup %2075  ;;  %635 = vrot.lane.b32.xlu1 %v2074_v38, %s2263_s0 }
 0x698   :  { %457 = vrot.lane.b32.xlu0 %v2076_v39, %s2263_s0  ;;  %v2078_v41 = vpop.eup %2077 }
 0x699   :  { %v2080_v42 = vpop.eup %2079  ;;  %v629_v43 = vadd.f32 1.0, %v2078_v41 }
 0x69a   :  { %v451_v45 = vadd.f32 1.0, %v2080_v42 }
 0x69b   :  { %2081 = vrcp.f32 %v629_v43 }
 0x69c   :  { %2083 = vrcp.f32 %v451_v45 }
 0x6a5   :  { %v2082_v46 = vpop.eup %2081 }
 0x6a6   :  { %v2084_v48 = vpop.eup %2083  ;;  %v633_v52 = vmul.f32 %v2082_v46, %v379_v4 }
 0x6a7   :  { %v455_v54 = vmul.f32 %v2084_v48, %v350_v6 }
 0x709   :  { %v636_v47 = vpop.permute.xlu1 %635 }
 0x70a   :  { %v638_v49 = vmul.f32 %v2082_v46, %v636_v47  ;;  %v458_v50 = vpop.permute.xlu0 %457 }
 0x70b   :  { %v460_v51 = vmul.f32 %v2084_v48, %v458_v50  ;;  %v357_v50 = vld [vmem:[#allocation5] sm:$0xff] }
 0x70c   :  { %640 = vrot.lane.b32.xlu1 %v638_v49, %s2264_s2 }
 0x70d   :  { %462 = vrot.lane.b32.xlu0 %v460_v51, %s2264_s2  ;;  %v358_v51 = vld [vmem:[#allocation5 + $0x8] sm:$0xff] }
 0x77e   :  { %v641_v53 = vpop.permute.xlu1 %640 }
 0x77f   :  { %v2433_v55 = vadd.f32 %v641_v53, %v633_v52  ;;  %v463_v56 = vpop.permute.xlu0 %462  ;;  %v1984_v52 = vpack.c.bf16 %v358_v51, %v357_v50 }
 0x780   :  { %v2435_v57 = vadd.f32 %v463_v56, %v455_v54 }
 0x781   :  { %2085 = vtanh.f32 %v2433_v55  ;;  %1985 = vmatpush3.bf16.msra.mxu0 %v1984_v52 }
 0x782   :  { %2087 = vtanh.f32 %v2435_v57  ;;  %1986 = vmatprep.subr.bf16.mxu0 %v2266_v61 }
 0x785   :  { %1988 = vmatpush3.bf16.msra.mxu0 %v1987_v63 }
 0x786   :  { %1989 = vmatprep.subr.bf16.mxu0 %v2266_v61 }
 0x78b   :  { %v2086_v2 = vpop.eup %2085 }
 0x78c   :  { %v2088_v3 = vpop.eup %2087  ;;  %646 = vrot.lane.b32.xlu1 %v2086_v2, %s2263_s0 }
 0x78d   :  { %468 = vrot.lane.b32.xlu0 %v2088_v3, %s2263_s0  ;;  %v735_v3 = vld [vmem:[#allocation5 + $0x40] sm:$0xff] }
 0x7fe   :  { %v647_v4 = vpop.permute.xlu1 %646 }
 0x7ff   :  { %v649_v5 = vmul.f32 %v2082_v46, %v647_v4  ;;  %v469_v6 = vpop.permute.xlu0 %468  ;;  %v736_v4 = vld [vmem:[#allocation5 + $0x48] sm:$0xff] }
 0x800   :  { %v471_v7 = vmul.f32 %v2084_v48, %v469_v6 }
 0x801   :  { %v657_v8 = vrot.slane %v649_v5, %v2349_v12 }
 0x802   :  { %477 = vrot.lane.b32.xlu0 %v471_v7, %s2264_s2 }
 0x803   :  { %658 = vrot.lane.b32.xlu1 %v657_v8, %s2264_s2 }
 0x806   :  { %661 = vrot.lane.b32.xlu0 %v471_v7, %s2263_s0 }
 0x874   :  { %v478_v9 = vpop.permute.xlu0 %477 }
 0x875   :  { %1894 = vmatmul.mubr.msk.f32.vlgmr.msra.gmra.mrb[2].mxu1 %vm238_vm1, %v478_v9  ;;  %v659_v11 = vpop.permute.xlu1 %658  ;;  %v1990_v9 = vpack.c.bf16 %v736_v4, %v735_v3  ;;  %v925_v4 = vld [vmem:[#allocation5 + $0x60] sm:$0xff] }
 0x876   :  { %670 = vmatpush1.bf16.msra.mxu1 %v2364_v28  ;;  %701 = vmatprep.mubr.bf16.mxu1 %v2265_v36 }
 0x877   :  { %671 = vmatprep.subr.bf16.mxu1 %v2366_v29 }
 0x878   :  { %v662_v10 = vpop.permute.xlu0 %661 }
 0x879   :  { %v664_v16 = vsel %vm238_vm1, %v659_v11, %v662_v10  ;;  %v737_v10 = vld [vmem:[#allocation5 + $0x50] sm:$0xff]  ;;  %v738_v11 = vld [vmem:[#allocation5 + $0x58] sm:$0xff] }
 0x87a   :  { %672 = vmatpush1.bf16.msra.mxu1 %v2371_v30  ;;  %v665_v17 = vpack.c.bf16 %v664_v16, %v664_v16 }
 0x87b   :  { %673 = vmatprep.subr.bf16.mxu1 %v2375_v31 }
 0x87e   :  { %674 = vmatpush1.bf16.msra.mxu1 %v2379_v32 }
 0x87f   :  { %675 = vmatprep.subr.bf16.mxu1 %v2383_v34 }
 0x882   :  { %676 = vmatpush1.bf16.msra.mxu1 %v2391_v35 }
 0x883   :  { %1995 = vmatprep.subr.bf16.mxu1 %v2266_v61 }
 0x885   :  { %1810 = vmatmul.mubr.msk.bf16.vlgmr.msra.gmra.mrb[8].mxu1 %vm281_vm2, %v665_v17 }
 0x886   :  { %1926 = vmatprep.mubr.msk.f32.mxu1 %vm2267_vm3, %v2268_v0 }
 0x948   :  { %v2467_v18 = vpop.f32.mrb[2].mxu1 }
 0x949   :  { %v1895_v19 = vpop.f32.mrb[3].mxu1 }
 0x958   :  { %v703_v21 = vpop.f32.mrb[8].mxu1 }
 0x959   :  { %v815_v23 = vadd.f32 %v703_v21, %v167_v20  ;;  %v705_v24 = vpop.f32.mrb[9].mxu1 }
 0x95a   :  { %v710_v25 = vadd.f32 %v2404_v44, %v705_v24  ;;  %v707_v26 = vpop.f32.mrb[10].mxu1 }
 0x95b   :  { %2089 = vtanh.f32 %v815_v23  ;;  %v708_v33 = vpop.f32.mrb[11].mxu1  ;;  %v1813_v39 = vmul.f32 -1.442695, %v815_v23 }
 0x95c   :  { %2091 = vtanh.f32 %v710_v25  ;;  %v1811_v15 = vmul.f32 -1.442695, %v710_v25 }
 0x95d   :  { %2093 = vpow2.f32 %v1813_v39  ;;  %v2518_v39 = vrot.slane %v2351_v13, %v2349_v12 }
 0x95e   :  { %2095 = vpow2.f32 %v1811_v15 }
 0x965   :  { %v2090_v37 = vpop.eup %2089 }
 0x966   :  { %v2092_v38 = vpop.eup %2091  ;;  %825 = vrot.lane.b32.xlu0 %v2090_v37, %s2263_s0 }
 0x967   :  { %720 = vrot.lane.b32.xlu1 %v2092_v38, %s2263_s0  ;;  %v2094_v22 = vpop.eup %2093 }
 0x968   :  { %v2096_v40 = vpop.eup %2095  ;;  %v819_v41 = vadd.f32 1.0, %v2094_v22 }
 0x969   :  { %v714_v42 = vadd.f32 1.0, %v2096_v40 }
 0x96a   :  { %2097 = vrcp.f32 %v819_v41 }
 0x96b   :  { %2099 = vrcp.f32 %v714_v42 }
 0x974   :  { %v2098_v43 = vpop.eup %2097 }
 0x975   :  { %v2100_v46 = vpop.eup %2099  ;;  %v823_v53 = vmul.f32 %v2098_v43, %v2433_v55 }
 0x976   :  { %v718_v56 = vmul.f32 %v2100_v46, %v2435_v57 }
 0x9d8   :  { %v826_v45 = vpop.permute.xlu0 %825 }
 0x9d9   :  { %v828_v47 = vmul.f32 %v2098_v43, %v826_v45  ;;  %v721_v48 = vpop.permute.xlu1 %720 }
 0x9da   :  { %v723_v49 = vmul.f32 %v2100_v46, %v721_v48 }
 0x9db   :  { %830 = vrot.lane.b32.xlu0 %v828_v47, %s2264_s2 }
 0x9dc   :  { %725 = vrot.lane.b32.xlu1 %v723_v49, %s2264_s2 }
 0xa4d   :  { %v831_v54 = vpop.permute.xlu0 %830 }
 0xa4e   :  { %v2479_v60 = vadd.f32 %v831_v54, %v823_v53  ;;  %v726_v62 = vpop.permute.xlu1 %725 }
 0xa4f   :  { %v2481_v1 = vadd.f32 %v726_v62, %v718_v56 }
 0xa50   :  { %2101 = vtanh.f32 %v2479_v60 }
 0xa51   :  { %2103 = vtanh.f32 %v2481_v1 }
 0xa5a   :  { %v2102_v2 = vpop.eup %2101 }
 0xa5b   :  { %v2104_v55 = vpop.eup %2103  ;;  %836 = vrot.lane.b32.xlu0 %v2102_v2, %s2263_s0 }
 0xa5c   :  { %731 = vrot.lane.b32.xlu1 %v2104_v55, %s2263_s0 }
 0xa60   :  { %551 = vrot.lane.b32.xlu1 %v2414_v14, %s2264_s2  ;;  %v1993_v14 = vpack.c.bf16 %v738_v11, %v737_v10 }
 0xacd   :  { %v837_v57 = vpop.permute.xlu0 %836 }
 0xace   :  { %v839_v5 = vmul.f32 %v2098_v43, %v837_v57  ;;  %v732_v6 = vpop.permute.xlu1 %731 }
 0xacf   :  { %v734_v7 = vmul.f32 %v2100_v46, %v732_v6  ;;  %v927_v6 = vld [vmem:[#allocation5 + $0x70] sm:$0xff] }
 0xad0   :  { %v847_v8 = vrot.slane %v839_v5, %v2349_v12  ;;  %v926_v5 = vld [vmem:[#allocation5 + $0x68] sm:$0xff] }
 0xad1   :  { %740 = vrot.lane.b32.xlu0 %v734_v7, %s2264_s2 }
 0xad2   :  { %v552_v16 = vpop.permute.xlu1 %551  ;;  %848 = vrot.lane.b32.xlu1 %v847_v8, %s2264_s2  ;;  %v928_v8 = vld [vmem:[#allocation5 + $0x78] sm:$0xff] }
 0xad3   :  { %1905 = vmatmul.mubr.msk.f32.vlgmr.msra.gmra.mrb[4].mxu0 %vm238_vm1, %v552_v16 }
 0xad4   :  { %1991 = vmatpush3.bf16.msra.mxu0 %v1990_v9  ;;  %1915 = vmatprep.mubr.msk.f32.mxu0 %vm2267_vm3, %v2268_v0  ;;  %v1999_v9 = vpack.c.bf16 %v928_v8, %v927_v6  ;;  %v1117_v6 = vld [vmem:[#allocation5 + $0x90] sm:$0xff]  ;;  %v1118_v8 = vld [vmem:[#allocation5 + $0x98] sm:$0xff] }
 0xad5   :  { %851 = vrot.lane.b32.xlu0 %v734_v7, %s2263_s0  ;;  %1992 = vmatprep.subr.bf16.mxu0 %v2266_v61  ;;  %v1996_v7 = vpack.c.bf16 %v926_v5, %v925_v4  ;;  %v1115_v4 = vld [vmem:[#allocation5 + $0x80] sm:$0xff]  ;;  %v1116_v5 = vld [vmem:[#allocation5 + $0x88] sm:$0xff] }
 0xad7   :  { %1997 = vmatpush3.bf16.msra.mxu1 %v1996_v7  ;;  %v2002_v7 = vpack.c.bf16 %v1116_v5, %v1115_v4  ;;  %v1305_v4 = vld [vmem:[#allocation5 + $0xa0] sm:$0xff]  ;;  %v1306_v5 = vld [vmem:[#allocation5 + $0xa8] sm:$0xff] }
 0xad8   :  { %1994 = vmatpush3.bf16.msra.mxu0 %v1993_v14  ;;  %1998 = vmatprep.subr.bf16.mxu1 %v2266_v61 }
 0xad9   :  { %859 = vmatprep.subr.bf16.mxu0 %v2362_v27 }
 0xadb   :  { %2000 = vmatpush3.bf16.msra.mxu1 %v1999_v9  ;;  %v2005_v9 = vpack.c.bf16 %v1118_v8, %v1117_v6  ;;  %v1307_v6 = vld [vmem:[#allocation5 + $0xb0] sm:$0xff]  ;;  %v1308_v8 = vld [vmem:[#allocation5 + $0xb8] sm:$0xff] }
 0xadc   :  { %1049 = vmatprep.subr.bf16.mxu1 %v2362_v27 }
 0xb43   :  { %v741_v17 = vpop.permute.xlu0 %740 }
 0xb44   :  { %1916 = vmatmul.mubr.msk.f32.vlgmr.msra.gmra.mrb[6].mxu0 %vm238_vm1, %v741_v17  ;;  %v849_v20 = vpop.permute.xlu1 %848 }
 0xb45   :  { %860 = vmatpush1.bf16.msra.mxu0 %v2364_v28  ;;  %891 = vmatprep.mubr.bf16.mxu0 %v2265_v36 }
 0xb46   :  { %861 = vmatprep.subr.bf16.mxu0 %v2366_v29 }
 0xb47   :  { %v852_v19 = vpop.permute.xlu0 %851 }
 0xb48   :  { %v854_v21 = vsel %vm238_vm1, %v849_v20, %v852_v19 }
 0xb49   :  { %862 = vmatpush1.bf16.msra.mxu0 %v2371_v30  ;;  %v855_v23 = vpack.c.bf16 %v854_v21, %v854_v21 }
 0xb4a   :  { %863 = vmatprep.subr.bf16.mxu0 %v2375_v31 }
 0xb4d   :  { %864 = vmatpush1.bf16.msra.mxu0 %v2379_v32 }
 0xb4e   :  { %865 = vmatprep.subr.bf16.mxu0 %v2383_v34 }
 0xb51   :  { %866 = vmatpush1.bf16.msra.mxu0 %v2391_v35 }
 0xb52   :  { %2001 = vmatprep.subr.bf16.mxu0 %v2266_v61 }
 0xb54   :  { %1814 = vmatmul.mubr.msk.bf16.vlgmr.msra.gmra.mrb[8].mxu0 %vm281_vm2, %v855_v23 }
 0xb55   :  { %1937 = vmatprep.mubr.msk.f32.mxu0 %vm2267_vm3, %v2268_v0  ;;  %2003 = vmatpush3.bf16.msra.mxu0 %v2002_v7  ;;  %v2008_v7 = vpack.c.bf16 %v1306_v5, %v1305_v4 }
 0xb56   :  { %2004 = vmatprep.subr.bf16.mxu0 %v2266_v61 }
 0xb59   :  { %2006 = vmatpush3.bf16.msra.mxu0 %v2005_v9  ;;  %v2011_v9 = vpack.c.bf16 %v1308_v8, %v1307_v6  ;;  %v2178_v6 = vld [vmem:[#allocation2] ss:$8 sps:$4 sm:$0xff]   ;;  %v2180_v8 = vld [vmem:[#allocation2 + $0x10] ss:$8 sps:$4 sm:$0xff]  }
 0xb5a   :  { %1239 = vmatprep.subr.bf16.mxu0 %v2362_v27 }
 0xba6   :  { %v621_v24 = vpop.f32.mrb[4].mxu0 }
 0xba7   :  { %v622_v25 = vadd.f32 %v621_v24, %v2467_v18  ;;  %v1906_v26 = vpop.f32.mrb[5].mxu0 }
 0xc17   :  { %v810_v33 = vpop.f32.mrb[6].mxu0 }
 0xc18   :  { %v2514_v37 = vadd.f32 %v810_v33, %v622_v25  ;;  %v1917_v38 = vpop.f32.mrb[7].mxu0 }
 0xc19   :  { %v183_v38 = vcombine.high %v2518_v39, %v2518_v39 }
 0xc27   :  { %v893_v15 = vpop.f32.mrb[8].mxu0 }
 0xc28   :  { %v1005_v22 = vadd.f32 %v893_v15, %v2518_v39  ;;  %v895_v40 = vpop.f32.mrb[9].mxu0 }
 0xc29   :  { %v900_v41 = vadd.f32 %v2404_v44, %v895_v40  ;;  %v897_v42 = vpop.f32.mrb[10].mxu0 }
 0xc2a   :  { %2105 = vtanh.f32 %v1005_v22  ;;  %v898_v43 = vpop.f32.mrb[11].mxu0  ;;  %v1817_v46 = vmul.f32 -1.442695, %v1005_v22 }
 0xc2b   :  { %2107 = vtanh.f32 %v900_v41  ;;  %v1815_v47 = vmul.f32 -1.442695, %v900_v41 }
 0xc2c   :  { %2109 = vpow2.f32 %v1817_v46 }
 0xc2d   :  { %2111 = vpow2.f32 %v1815_v47 }
 0xc34   :  { %v2106_v18 = vpop.eup %2105 }
 0xc35   :  { %v2108_v45 = vpop.eup %2107  ;;  %1015 = vrot.lane.b32.xlu0 %v2106_v18, %s2263_s0 }
 0xc36   :  { %910 = vrot.lane.b32.xlu1 %v2108_v45, %s2263_s0  ;;  %v2110_v48 = vpop.eup %2109 }
 0xc37   :  { %v2112_v49 = vpop.eup %2111  ;;  %v1009_v50 = vadd.f32 1.0, %v2110_v48 }
 0xc38   :  { %v904_v51 = vadd.f32 1.0, %v2112_v49 }
 0xc39   :  { %2113 = vrcp.f32 %v1009_v50 }
 0xc3a   :  { %2115 = vrcp.f32 %v904_v51 }
 0xc43   :  { %v2114_v52 = vpop.eup %2113 }
 0xc44   :  { %v2116_v54 = vpop.eup %2115  ;;  %v1013_v62 = vmul.f32 %v2114_v52, %v2479_v60 }
 0xc45   :  { %v908_v2 = vmul.f32 %v2116_v54, %v2481_v1 }
 0xca7   :  { %v1016_v53 = vpop.permute.xlu0 %1015 }
 0xca8   :  { %v1018_v56 = vmul.f32 %v2114_v52, %v1016_v53  ;;  %v911_v58 = vpop.permute.xlu1 %910 }
 0xca9   :  { %v913_v59 = vmul.f32 %v2116_v54, %v911_v58 }
 0xcaa   :  { %1020 = vrot.lane.b32.xlu0 %v1018_v56, %s2264_s2 }
 0xcab   :  { %915 = vrot.lane.b32.xlu1 %v913_v59, %s2264_s2 }
 0xd1c   :  { %v1021_v63 = vpop.permute.xlu0 %1020 }
 0xd1d   :  { %v2528_v55 = vadd.f32 %v1021_v63, %v1013_v62  ;;  %v916_v57 = vpop.permute.xlu1 %915 }
 0xd1e   :  { %v2530_v3 = vadd.f32 %v916_v57, %v908_v2 }
 0xd1f   :  { %2117 = vtanh.f32 %v2528_v55 }
 0xd20   :  { %2119 = vtanh.f32 %v2530_v3 }
 0xd29   :  { %v2118_v60 = vpop.eup %2117 }
 0xd2a   :  { %v2120_v1 = vpop.eup %2119  ;;  %1026 = vrot.lane.b32.xlu0 %v2118_v60, %s2263_s0 }
 0xd2b   :  { %921 = vrot.lane.b32.xlu1 %v2120_v1, %s2263_s0 }
 0xd9c   :  { %v1027_v10 = vpop.permute.xlu0 %1026 }
 0xd9d   :  { %v1029_v11 = vmul.f32 %v2114_v52, %v1027_v10  ;;  %v922_v16 = vpop.permute.xlu1 %921 }
 0xd9e   :  { %v924_v14 = vmul.f32 %v2116_v54, %v922_v16 }
 0xd9f   :  { %v1037_v17 = vrot.slane %v1029_v11, %v2349_v12 }
 0xda0   :  { %930 = vrot.lane.b32.xlu1 %v924_v14, %s2264_s2 }
 0xda1   :  { %1038 = vrot.lane.b32.xlu0 %v1037_v17, %s2264_s2 }
 0xda4   :  { %1041 = vrot.lane.b32.xlu1 %v924_v14, %s2263_s0 }
 0xe12   :  { %v931_v19 = vpop.permute.xlu1 %930 }
 0xe13   :  { %1927 = vmatmul.mubr.msk.f32.vlgmr.msra.gmra.mrb[12].mxu1 %vm238_vm1, %v931_v19  ;;  %v1039_v21 = vpop.permute.xlu0 %1038 }
 0xe14   :  { %1050 = vmatpush1.bf16.msra.mxu1 %v2364_v28  ;;  %1081 = vmatprep.mubr.bf16.mxu1 %v2265_v36 }
 0xe15   :  { %1051 = vmatprep.subr.bf16.mxu1 %v2366_v29 }
 0xe16   :  { %v1042_v20 = vpop.permute.xlu1 %1041 }
 0xe17   :  { %v1044_v23 = vsel %vm238_vm1, %v1039_v21, %v1042_v20 }
 0xe18   :  { %1052 = vmatpush1.bf16.msra.mxu1 %v2371_v30  ;;  %v1045_v24 = vpack.c.bf16 %v1044_v23, %v1044_v23 }
 0xe19   :  { %1053 = vmatprep.subr.bf16.mxu1 %v2375_v31 }
 0xe1c   :  { %1054 = vmatpush1.bf16.msra.mxu1 %v2379_v32 }
 0xe1d   :  { %1055 = vmatprep.subr.bf16.mxu1 %v2383_v34 }
 0xe20   :  { %1056 = vmatpush1.bf16.msra.mxu1 %v2391_v35 }
 0xe21   :  { %2007 = vmatprep.subr.bf16.mxu1 %v2266_v61 }
 0xe23   :  { %1818 = vmatmul.mubr.msk.bf16.vlgmr.msra.gmra.mrb[16].mxu1 %vm281_vm2, %v1045_v24 }
 0xe24   :  { %1948 = vmatprep.mubr.msk.f32.mxu1 %vm2267_vm3, %v2268_v0  ;;  %2009 = vmatpush3.bf16.msra.mxu1 %v2008_v7  ;;  %v2179_v7 = vld [vmem:[#allocation2 + $0x14] ss:$8 sps:$4 sm:$0xff]  }
 0xe25   :  { %2010 = vmatprep.subr.bf16.mxu1 %v2266_v61 }
 0xe28   :  { %2012 = vmatpush3.bf16.msra.mxu1 %v2011_v9  ;;  %v2181_v9 = vld [vmem:[#allocation2 + $0x24] ss:$8 sps:$4 sm:$0xff]  }
 0xe29   :  { %1429 = vmatprep.subr.bf16.mxu1 %v2362_v27 }
 0xee6   :  { %v1000_v25 = vpop.f32.mrb[12].mxu1 }
 0xee7   :  { %v2557_v26 = vadd.f32 %v1000_v25, %v2514_v37  ;;  %v1928_v33 = vpop.f32.mrb[13].mxu1 }
 0xee8   :  { %v168_v33 = vcombine.high %v2351_v13, %v2351_v13 }
 0xef6   :  { %v1083_v15 = vpop.f32.mrb[16].mxu1 }
 0xef7   :  { %v1195_v22 = vadd.f32 %v1083_v15, %v183_v38  ;;  %v1085_v40 = vpop.f32.mrb[17].mxu1  ;;  %v2602_v38 = vrot.slane %v168_v33, %v2349_v12 }
 0xef8   :  { %v1090_v41 = vadd.f32 %v2404_v44, %v1085_v40  ;;  %v1087_v42 = vpop.f32.mrb[18].mxu1 }
 0xef9   :  { %2121 = vtanh.f32 %v1195_v22  ;;  %v1088_v43 = vpop.f32.mrb[19].mxu1  ;;  %v1821_v37 = vmul.f32 -1.442695, %v1195_v22 }
 0xefa   :  { %2123 = vtanh.f32 %v1090_v41  ;;  %v1819_v46 = vmul.f32 -1.442695, %v1090_v41 }
 0xefb   :  { %2125 = vpow2.f32 %v1821_v37 }
 0xefc   :  { %2127 = vpow2.f32 %v1819_v46 }
 0xf03   :  { %v2122_v18 = vpop.eup %2121 }
 0xf04   :  { %v2124_v45 = vpop.eup %2123  ;;  %1205 = vrot.lane.b32.xlu1 %v2122_v18, %s2263_s0 }
 0xf05   :  { %1100 = vrot.lane.b32.xlu0 %v2124_v45, %s2263_s0  ;;  %v2126_v39 = vpop.eup %2125 }
 0xf06   :  { %v2128_v47 = vpop.eup %2127  ;;  %v1199_v48 = vadd.f32 1.0, %v2126_v39 }
 0xf07   :  { %v1094_v49 = vadd.f32 1.0, %v2128_v47 }
 0xf08   :  { %2129 = vrcp.f32 %v1199_v48 }
 0xf09   :  { %2131 = vrcp.f32 %v1094_v49 }
 0xf12   :  { %v2130_v50 = vpop.eup %2129 }
 0xf13   :  { %v2132_v52 = vpop.eup %2131  ;;  %v1203_v58 = vmul.f32 %v2130_v50, %v2528_v55 }
 0xf14   :  { %v1098_v62 = vmul.f32 %v2132_v52, %v2530_v3 }
 0xf76   :  { %v1206_v51 = vpop.permute.xlu1 %1205 }
 0xf77   :  { %v1208_v53 = vmul.f32 %v2130_v50, %v1206_v51  ;;  %v1101_v54 = vpop.permute.xlu0 %1100 }
 0xf78   :  { %v1103_v56 = vmul.f32 %v2132_v52, %v1101_v54 }
 0xf79   :  { %1210 = vrot.lane.b32.xlu1 %v1208_v53, %s2264_s2 }
 0xf7a   :  { %1105 = vrot.lane.b32.xlu0 %v1103_v56, %s2264_s2 }
 0xfeb   :  { %v1211_v59 = vpop.permute.xlu1 %1210 }
 0xfec   :  { %v2568_v63 = vadd.f32 %v1211_v59, %v1203_v58  ;;  %v1106_v2 = vpop.permute.xlu0 %1105 }
 0xfed   :  { %v2570_v57 = vadd.f32 %v1106_v2, %v1098_v62 }
 0xfee   :  { %2133 = vtanh.f32 %v2568_v63 }
 0xfef   :  { %2135 = vtanh.f32 %v2570_v57 }
 0xff8   :  { %v2134_v55 = vpop.eup %2133 }
 0xff9   :  { %v2136_v3 = vpop.eup %2135  ;;  %1216 = vrot.lane.b32.xlu1 %v2134_v55, %s2263_s0 }
 0xffa   :  { %1111 = vrot.lane.b32.xlu0 %v2136_v3, %s2263_s0 }
0x106b   :  { %v1217_v60 = vpop.permute.xlu1 %1216 }
0x106c   :  { %v1219_v1 = vmul.f32 %v2130_v50, %v1217_v60  ;;  %v1112_v10 = vpop.permute.xlu0 %1111 }
0x106d   :  { %v1114_v11 = vmul.f32 %v2132_v52, %v1112_v10 }
0x106e   :  { %v1227_v16 = vrot.slane %v1219_v1, %v2349_v12 }
0x106f   :  { %1120 = vrot.lane.b32.xlu0 %v1114_v11, %s2264_s2 }
0x1070   :  { %1228 = vrot.lane.b32.xlu1 %v1227_v16, %s2264_s2 }
0x1073   :  { %1231 = vrot.lane.b32.xlu0 %v1114_v11, %s2263_s0 }
0x10e1   :  { %v1121_v14 = vpop.permute.xlu0 %1120 }
0x10e2   :  { %1938 = vmatmul.mubr.msk.f32.vlgmr.msra.gmra.mrb[12].mxu0 %vm238_vm1, %v1121_v14  ;;  %v1229_v19 = vpop.permute.xlu1 %1228 }
0x10e3   :  { %1240 = vmatpush1.bf16.msra.mxu0 %v2364_v28  ;;  %1271 = vmatprep.mubr.bf16.mxu0 %v2265_v36 }
0x10e4   :  { %1241 = vmatprep.subr.bf16.mxu0 %v2366_v29 }
0x10e5   :  { %v1232_v17 = vpop.permute.xlu0 %1231 }
0x10e6   :  { %v1234_v20 = vsel %vm238_vm1, %v1229_v19, %v1232_v17 }
0x10e7   :  { %1242 = vmatpush1.bf16.msra.mxu0 %v2371_v30  ;;  %v1235_v21 = vpack.c.bf16 %v1234_v20, %v1234_v20 }
0x10e8   :  { %1243 = vmatprep.subr.bf16.mxu0 %v2375_v31 }
0x10eb   :  { %1244 = vmatpush1.bf16.msra.mxu0 %v2379_v32 }
0x10ec   :  { %1245 = vmatprep.subr.bf16.mxu0 %v2383_v34 }
0x10ef   :  { %1246 = vmatpush1.bf16.msra.mxu0 %v2391_v35 }
0x10f0   :  { %2013 = vmatprep.subr.bf16.mxu0 %v2266_v61 }
0x10f2   :  { %1822 = vmatmul.mubr.msk.bf16.vlgmr.msra.gmra.mrb[16].mxu0 %vm281_vm2, %v1235_v21 }
0x10f3   :  { %1959 = vmatprep.mubr.msk.f32.mxu0 %vm2267_vm3, %v2268_v0 }
0x11b5   :  { %v1190_v23 = vpop.f32.mrb[12].mxu0 }
0x11b6   :  { %v2597_v24 = vadd.f32 %v1190_v23, %v2557_v26  ;;  %v1939_v25 = vpop.f32.mrb[13].mxu0 }
0x11c5   :  { %v1273_v15 = vpop.f32.mrb[16].mxu0 }
0x11c6   :  { %v1385_v22 = vadd.f32 %v1273_v15, %v2602_v38  ;;  %v1275_v40 = vpop.f32.mrb[17].mxu0 }
0x11c7   :  { %v1280_v41 = vadd.f32 %v2404_v44, %v1275_v40  ;;  %v1277_v42 = vpop.f32.mrb[18].mxu0 }
0x11c8   :  { %2137 = vtanh.f32 %v1385_v22  ;;  %v1278_v43 = vpop.f32.mrb[19].mxu0  ;;  %v1825_v13 = vmul.f32 -1.442695, %v1385_v22 }
0x11c9   :  { %2139 = vtanh.f32 %v1280_v41  ;;  %v1823_v45 = vmul.f32 -1.442695, %v1280_v41 }
0x11ca   :  { %2141 = vpow2.f32 %v1825_v13 }
0x11cb   :  { %2143 = vpow2.f32 %v1823_v45 }
0x11d2   :  { %v2138_v18 = vpop.eup %2137 }
0x11d3   :  { %v2140_v26 = vpop.eup %2139  ;;  %1395 = vrot.lane.b32.xlu0 %v2138_v18, %s2263_s0 }
0x11d4   :  { %1290 = vrot.lane.b32.xlu1 %v2140_v26, %s2263_s0  ;;  %v2142_v37 = vpop.eup %2141 }
0x11d5   :  { %v2144_v46 = vpop.eup %2143  ;;  %v1389_v39 = vadd.f32 1.0, %v2142_v37 }
0x11d6   :  { %v1284_v47 = vadd.f32 1.0, %v2144_v46 }
0x11d7   :  { %2145 = vrcp.f32 %v1389_v39 }
0x11d8   :  { %2147 = vrcp.f32 %v1284_v47  ;;  %v1495_v47 = vld [vmem:[#allocation5 + $0xc0] sm:$0xff] }
0x11e1   :  { %v2146_v48 = vpop.eup %2145 }
0x11e2   :  { %v2148_v50 = vpop.eup %2147  ;;  %v1393_v54 = vmul.f32 %v2146_v48, %v2568_v63 }
0x11e3   :  { %v1288_v58 = vmul.f32 %v2148_v50, %v2570_v57 }
0x1245   :  { %v1396_v49 = vpop.permute.xlu0 %1395 }
0x1246   :  { %v1398_v51 = vmul.f32 %v2146_v48, %v1396_v49  ;;  %v1291_v52 = vpop.permute.xlu1 %1290  ;;  %v1497_v49 = vld [vmem:[#allocation5 + $0xd0] sm:$0xff] }
0x1247   :  { %v1293_v53 = vmul.f32 %v2148_v50, %v1291_v52 }
0x1248   :  { %1400 = vrot.lane.b32.xlu0 %v1398_v51, %s2264_s2  ;;  %v1498_v51 = vld [vmem:[#allocation5 + $0xd8] sm:$0xff] }
0x1249   :  { %1295 = vrot.lane.b32.xlu1 %v1293_v53, %s2264_s2  ;;  %v2017_v52 = vpack.c.bf16 %v1498_v51, %v1497_v49 }
0x12ba   :  { %v1401_v56 = vpop.permute.xlu0 %1400 }
0x12bb   :  { %v2612_v59 = vadd.f32 %v1401_v56, %v1393_v54  ;;  %v1296_v62 = vpop.permute.xlu1 %1295  ;;  %v2177_v56 = vld [vmem:[#allocation2 + $0x4] ss:$8 sps:$4 sm:$0xff]  }
0x12bc   :  { %v2614_v2 = vadd.f32 %v1296_v62, %v1288_v58 }
0x12bd   :  { %2149 = vtanh.f32 %v2612_v59 }
0x12be   :  { %2151 = vtanh.f32 %v2614_v2 }
0x12c7   :  { %v2150_v63 = vpop.eup %2149 }
0x12c8   :  { %v2152_v57 = vpop.eup %2151  ;;  %1406 = vrot.lane.b32.xlu0 %v2150_v63, %s2263_s0  ;;  %v2182_v63 = vld [vmem:[#allocation2 + $0x20] ss:$8 sps:$4 sm:$0xff]  }
0x12c9   :  { %1301 = vrot.lane.b32.xlu1 %v2152_v57, %s2263_s0 }
0x133a   :  { %v1407_v55 = vpop.permute.xlu0 %1406 }
0x133b   :  { %v1409_v3 = vmul.f32 %v2146_v48, %v1407_v55  ;;  %v1302_v60 = vpop.permute.xlu1 %1301  ;;  %v1496_v48 = vld [vmem:[#allocation5 + $0xc8] sm:$0xff]  ;;  %v2183_v55 = vld [vmem:[#allocation2 + $0x34] ss:$8 sps:$4 sm:$0xff]  }
0x133c   :  { %v1304_v1 = vmul.f32 %v2148_v50, %v1302_v60  ;;  %v2014_v50 = vpack.c.bf16 %v1496_v48, %v1495_v47  ;;  %v2184_v60 = vld [vmem:[#allocation2 + $0x30] ss:$8 sps:$4 sm:$0xff]  }
0x133d   :  { %v1417_v10 = vrot.slane %v1409_v3, %v2349_v12 }
0x133e   :  { %1310 = vrot.lane.b32.xlu1 %v1304_v1, %s2264_s2  ;;  %2015 = vmatpush3.bf16.msra.mxu0 %v2014_v50 }
0x133f   :  { %1418 = vrot.lane.b32.xlu0 %v1417_v10, %s2264_s2  ;;  %2016 = vmatprep.subr.bf16.mxu0 %v2266_v61 }
0x1342   :  { %1421 = vrot.lane.b32.xlu1 %v1304_v1, %s2263_s0  ;;  %2018 = vmatpush3.bf16.msra.mxu0 %v2017_v52 }
0x1343   :  { %1619 = vmatprep.subr.bf16.mxu0 %v2177_v56 }
0x13b0   :  { %v1311_v11 = vpop.permute.xlu1 %1310 }
0x13b1   :  { %1949 = vmatmul.mubr.msk.f32.vlgmr.msra.gmra.mrb[14].mxu1 %vm238_vm1, %v1311_v11  ;;  %v1419_v16 = vpop.permute.xlu0 %1418 }
0x13b2   :  { %1430 = vmatpush1.bf16.msra.mxu1 %v2364_v28  ;;  %1461 = vmatprep.mubr.bf16.mxu1 %v2265_v36 }
0x13b3   :  { %1431 = vmatprep.subr.bf16.mxu1 %v2366_v29 }
0x13b4   :  { %v1422_v27 = vpop.permute.xlu1 %1421 }
0x13b5   :  { %v1424_v14 = vsel %vm238_vm1, %v1419_v16, %v1422_v27 }
0x13b6   :  { %1432 = vmatpush1.bf16.msra.mxu1 %v2371_v30  ;;  %v1425_v17 = vpack.c.bf16 %v1424_v14, %v1424_v14  ;;  %v2185_v14 = vld [vmem:[%s2696_s4] ss:$0 sm:$0xff] }
0x13b7   :  { %1433 = vmatprep.subr.bf16.mxu1 %v2375_v31  ;;  %v184_v31 = vcombine.high %v2602_v38, %v2602_v38 }
0x13ba   :  { %1434 = vmatpush1.bf16.msra.mxu1 %v2379_v32 }
0x13bb   :  { %1435 = vmatprep.subr.bf16.mxu1 %v2383_v34 }
0x13be   :  { %1436 = vmatpush1.bf16.msra.mxu1 %v2391_v35 }
0x13bf   :  { %2019 = vmatprep.subr.bf16.mxu1 %v2266_v61 }
0x13c1   :  { %1826 = vmatmul.mubr.msk.bf16.vlgmr.msra.gmra.mrb[20].mxu1 %vm281_vm2, %v1425_v17 }
0x13c2   :  { %1970 = vmatprep.mubr.msk.f32.mxu1 %vm2267_vm3, %v2268_v0 }
0x1484   :  { %v1380_v28 = vpop.f32.mrb[14].mxu1 }
0x1485   :  { %v2641_v29 = vadd.f32 %v1380_v28, %v2597_v24  ;;  %v1950_v30 = vpop.f32.mrb[15].mxu1 }
0x1494   :  { %v1463_v32 = vpop.f32.mrb[20].mxu1 }
0x1495   :  { %v1575_v34 = vadd.f32 %v1463_v32, %v184_v31  ;;  %v1465_v19 = vpop.f32.mrb[21].mxu1 }
0x1496   :  { %v1470_v35 = vadd.f32 %v2404_v44, %v1465_v19  ;;  %v1467_v20 = vpop.f32.mrb[22].mxu1 }
0x1497   :  { %2153 = vtanh.f32 %v1575_v34  ;;  %v1468_v21 = vpop.f32.mrb[23].mxu1  ;;  %v1829_v0 = vmul.f32 -1.442695, %v1575_v34 }
0x1498   :  { %2155 = vtanh.f32 %v1470_v35  ;;  %v1827_v24 = vmul.f32 -1.442695, %v1470_v35 }
0x1499   :  { %2157 = vpow2.f32 %v1829_v0  ;;  %v1684_v0 = vld [vmem:[#allocation5 + $0xe0] sm:$0xff] }
0x149a   :  { %2159 = vpow2.f32 %v1827_v24  ;;  %v1685_v24 = vld [vmem:[#allocation5 + $0xe8] sm:$0xff] }
0x14a1   :  { %v2154_v23 = vpop.eup %2153 }
0x14a2   :  { %v2156_v25 = vpop.eup %2155  ;;  %1585 = vrot.lane.b32.xlu1 %v2154_v23, %s2263_s0 }
0x14a3   :  { %1480 = vrot.lane.b32.xlu0 %v2156_v25, %s2263_s0  ;;  %v2158_v33 = vpop.eup %2157 }
0x14a4   :  { %v2160_v38 = vpop.eup %2159  ;;  %v1579_v15 = vadd.f32 1.0, %v2158_v33  ;;  %v1686_v33 = vld [vmem:[#allocation5 + $0xf0] sm:$0xff] }
0x14a5   :  { %v1474_v22 = vadd.f32 1.0, %v2160_v38  ;;  %v2020_v38 = vpack.c.bf16 %v1685_v24, %v1684_v0 }
0x14a6   :  { %2161 = vrcp.f32 %v1579_v15  ;;  %v1687_v15 = vld [vmem:[#allocation5 + $0xf8] sm:$0xff] }
0x14a7   :  { %2163 = vrcp.f32 %v1474_v22  ;;  %2021 = vmatpush3.bf16.msra.mxu1 %v2020_v38  ;;  %v2023_v22 = vpack.c.bf16 %v1687_v15, %v1686_v33 }
0x14a8   :  { %2022 = vmatprep.subr.bf16.mxu1 %v2266_v61 }
0x14ab   :  { %2024 = vmatpush3.bf16.msra.mxu1 %v2023_v22 }
0x14b0   :  { %v2162_v44 = vpop.eup %2161 }
0x14b1   :  { %v2164_v41 = vpop.eup %2163  ;;  %v1583_v26 = vmul.f32 %v2162_v44, %v2612_v59 }
0x14b2   :  { %v1478_v45 = vmul.f32 %v2164_v41, %v2614_v2 }
0x1514   :  { %v1586_v40 = vpop.permute.xlu1 %1585 }
0x1515   :  { %v1588_v42 = vmul.f32 %v2162_v44, %v1586_v40  ;;  %v1481_v43 = vpop.permute.xlu0 %1480 }
0x1516   :  { %v1483_v18 = vmul.f32 %v2164_v41, %v1481_v43 }
0x1517   :  { %1590 = vrot.lane.b32.xlu1 %v1588_v42, %s2264_s2 }
0x1518   :  { %1485 = vrot.lane.b32.xlu0 %v1483_v18, %s2264_s2  ;;  %v1833_v18 = vld [vmem:[%s2698_s6] ss:$0 sm:$0xff] }
0x1589   :  { %v1591_v13 = vpop.permute.xlu1 %1590 }
0x158a   :  { %v1593_v37 = vadd.f32 %v1591_v13, %v1583_v26  ;;  %v1486_v46 = vpop.permute.xlu0 %1485 }
0x158b   :  { %v2652_v39 = vadd.f32 %v1486_v46, %v1478_v45 }
0x158c   :  { %2165 = vtanh.f32 %v1593_v37 }
0x158d   :  { %2167 = vtanh.f32 %v2652_v39 }
0x1596   :  { %v2166_v53 = vpop.eup %2165 }
0x1597   :  { %v2168_v54 = vpop.eup %2167  ;;  %1596 = vrot.lane.b32.xlu1 %v2166_v53, %s2263_s0 }
0x1598   :  { %1491 = vrot.lane.b32.xlu0 %v2168_v54, %s2263_s0 }
0x1609   :  { %v1597_v58 = vpop.permute.xlu1 %1596 }
0x160a   :  { %v1599_v59 = vmul.f32 %v2162_v44, %v1597_v58  ;;  %v1492_v62 = vpop.permute.xlu0 %1491 }
0x160b   :  { %v1494_v2 = vmul.f32 %v2164_v41, %v1492_v62 }
0x160c   :  { %v1607_v4 = vrot.slane %v1599_v59, %v2349_v12 }
0x160d   :  { %1500 = vrot.lane.b32.xlu0 %v1494_v2, %s2264_s2 }
0x160e   :  { %1608 = vrot.lane.b32.xlu1 %v1607_v4, %s2264_s2 }
0x1611   :  { %1611 = vrot.lane.b32.xlu0 %v1494_v2, %s2263_s0 }
0x167f   :  { %v1501_v5 = vpop.permute.xlu0 %1500 }
0x1680   :  { %1960 = vmatmul.mubr.msk.f32.vlgmr.msra.gmra.mrb[14].mxu0 %vm238_vm1, %v1501_v5  ;;  %v1609_v57 = vpop.permute.xlu1 %1608 }
0x1681   :  { %1620 = vmatpush1.bf16.msra.mxu0 %v2178_v6  ;;  %1651 = vmatprep.mubr.bf16.mxu0 %v2265_v36 }
0x1682   :  { %1621 = vmatprep.subr.bf16.mxu0 %v2179_v7 }
0x1683   :  { %v1612_v12 = vpop.permute.xlu0 %1611 }
0x1684   :  { %v1614_v3 = vsel %vm238_vm1, %v1609_v57, %v1612_v12 }
0x1685   :  { %1622 = vmatpush1.bf16.msra.mxu0 %v2180_v8  ;;  %v1615_v1 = vpack.c.bf16 %v1614_v3, %v1614_v3 }
0x1686   :  { %1623 = vmatprep.subr.bf16.mxu0 %v2181_v9 }
0x1689   :  { %1624 = vmatpush1.bf16.msra.mxu0 %v2182_v63 }
0x168a   :  { %1625 = vmatprep.subr.bf16.mxu0 %v2183_v55 }
0x168d   :  { %1626 = vmatpush1.bf16.msra.mxu0 %v2184_v60 }
0x1690   :  { %1830 = vmatmul.mubr.msk.bf16.vlgmr.msra.gmra.mrb[20].mxu0 %vm281_vm2, %v1615_v1 }
0x1753   :  { %v1570_v36 = vpop.f32.mrb[14].mxu0 }
0x1754   :  { %v1574_v10 = vadd.f32 %v1570_v36, %v2641_v29  ;;  %v1961_v11 = vpop.f32.mrb[15].mxu0 }
0x1763   :  { %v1653_v27 = vpop.f32.mrb[20].mxu0 }
0x1764   :  { %v1654_v16 = vpop.f32.mrb[21].mxu0 }
0x1765   :  { %v1659_v17 = vadd.f32 %v2185_v14, %v1654_v16  ;;  %v1656_v28 = vpop.f32.mrb[22].mxu0 }
0x1766   :  { %v1657_v30 = vpop.f32.mrb[23].mxu0 }
0x1767   :  { %2169 = vtanh.f32 %v1659_v17  ;;  %v1831_v32 = vmul.f32 -1.442695, %v1659_v17 }
0x1769   :  { %2171 = vpow2.f32 %v1831_v32 }
0x1771   :  { %v2170_v31 = vpop.eup %2169 }
0x1772   :  { %1669 = vrot.lane.b32.xlu1 %v2170_v31, %s2263_s0 }
0x1773   :  { %v2172_v34 = vpop.eup %2171 }
0x1774   :  { %v1663_v19 = vadd.f32 1.0, %v2172_v34 }
0x1776   :  { %2173 = vrcp.f32 %v1663_v19 }
0x1780   :  { %v2174_v29 = vpop.eup %2173 }
0x1781   :  { %v1667_v21 = vmul.f32 %v2174_v29, %v2652_v39 }
0x17e4   :  { %v1670_v35 = vpop.permute.xlu1 %1669 }
0x17e5   :  { %v1672_v20 = vmul.f32 %v2174_v29, %v1670_v35 }
0x17e7   :  { %1674 = vrot.lane.b32.xlu0 %v1672_v20, %s2264_s2 }
0x1859   :  { %v1675_v23 = vpop.permute.xlu0 %1674 }
0x185a   :  { %v1677_v25 = vadd.f32 %v1675_v23, %v1667_v21 }
0x185c   :  { %2175 = vtanh.f32 %v1677_v25 }
0x1866   :  { %v2176_v44 = vpop.eup %2175 }
0x1867   :  { %1680 = vrot.lane.b32.xlu1 %v2176_v44, %s2263_s0 }
0x18d9   :  { %v1681_v40 = vpop.permute.xlu1 %1680 }
0x18da   :  { %v1683_v41 = vmul.f32 %v2174_v29, %v1681_v40 }
0x18dc   :  { %1689 = vrot.lane.b32.xlu0 %v1683_v41, %s2264_s2 }
0x194e   :  { %v1690_v42 = vpop.permute.xlu0 %1689 }
0x194f   :  { %1971 = vmatmul.mubr.msk.f32.vlgmr.msra.gmra.mrb[24].mxu1 %vm238_vm1, %v1690_v42 }
0x1a22   :  { %v1759_v43 = vpop.f32.mrb[24].mxu1 }
0x1a23   :  { %v1763_v26 = vadd.f32 %v1759_v43, %v1574_v10  ;;  %v1972_v61 = vpop.f32.mrb[25].mxu1 }
0x1a25   :  { %v1771_v13 = vadd.f32 %v1833_v18, %v1763_v26 }
0x1a27   :  { %1772 = vst [vmem:[#allocation7] sm:$0x3] %v1771_v13 }
0x1a28   :  { %2241 = shalt.err (!%p2238_p6)
}
0x1a29   :  { %s2242_s21 = scalar_lea.hbm %s2699_s7, 32 }
0x1a2a   :  { %p2243_p7 = scmp.ne.s32.totalorder %s2699_s7, %s2242_s21  ;;  %p2246_p8 = scmp.lt.u32.totalorder %s2242_s21, %s2699_s7 }
0x1a2c   :  { %p2248_p9 = pnand %p2246_p8, %p2243_p7 }
0x1a2e   :  { %2251 = shalt.err (!%p2248_p9)
}
0x1a2f   :  { %1782 = dma.vmem_to_hbm [thread:$0]  %s1780_s17, 32, %s2699_s7, [#allocation4]  }
0x1a30   :  { %2256 = dma.done.wait [#allocation4], 32  }
0x1a31   :  { %2257 = vsyncadd [#allocation4], 4294967264 }
0x1a32   :  { %1786 = vsyncpa [#allocation3], 1 }
0x1a33   :  { %1787 = vsyncpa [#allocation6], 1 }
0x1a34   :  { %1788 = vsyncpa [#allocation4], 1 }

</bundles_post_ra>
